<compile_context>
chip_gen: v6e
topology: v6e:2x2x1
jax: 0.10.0
libtpu: 0.0.40
codegen_flags: <defaults>
</compile_context>

<pallas_src>
import functools

import jax
import jax.numpy as jnp
from jax import lax
from jax.experimental import pallas as pl
from jax.experimental.pallas import tpu as pltpu

# ----------------------------- synthetic cfg --------------------------------
NUM_POINTS_IN_PATCH = 64          # cfg.model.num_points_in_patch
SG_INPUT_DIM = 32                 # cfg.scene_graph_net.input_dim
SG_NUM_LAYERS = 2                 # cfg.scene_graph_net.num_layers (recep_field)
NODE_INPUT_DIM = 16               # cfg.scene_graph_net.node_input_dim
EDGE_INPUT_DIM = 8                # cfg.scene_graph_net.edge_input_dim
SINKHORN_ITERS = 5                # cfg.scene_graph_net.sinkhorn_iters
SINKHORN_EPS = 1e-3               # early-stop tol; unused with fixed iteration count
PT_OUT = 200                      # PointNetfeat out_size (hard-coded in the module)
PT_OUT_PAD = 256                  # lane-dense padded PointNet width (multiple of 128)
AFF_D = SG_INPUT_DIM * (SG_NUM_LAYERS + 1)    # Affinity dim = 96
AFF_D_PAD = 128                   # lane-dense padded affinity dim
GAT_OUT_PAD = 128                 # lane-dense padded GAT concat output (96 -> 128)
DENY_THR = 0.05                   # deny threshold of the use_topk=False branch


def _round_up(x, m):
    return ((x + m - 1) // m) * m


def _pad_axis(a, axis, n):
    if a.shape[axis] == n:
        return a
    pads = [(0, 0)] * a.ndim
    pads[axis] = (0, n - a.shape[axis])
    return jnp.pad(a, pads)


# ======================= kernel 1: PointNetfeat ==============================
def _pointnet_kernel(pts_ref, w1_ref, b1_ref, w2_ref, b2_ref, w3_ref, b3_ref,
                     out_ref, *, tm, p):
    # pts block: (TM, P, 3) -> one big (TM*P, C) matmul chain, max-pool per patch.
    pts = pts_ref[...].reshape(tm * p, 3)
    h = jnp.dot(pts, w1_ref[...], preferred_element_type=jnp.float32) + b1_ref[...]
    h = jnp.maximum(h, 0.0)                                           # relu(bn1(conv1))
    h = jnp.dot(h.astype(jnp.bfloat16), w2_ref[...],
                preferred_element_type=jnp.float32) + b2_ref[...]
    h = jnp.maximum(h, 0.0)                                           # relu(bn2(conv2))
    h = jnp.dot(h.astype(jnp.bfloat16), w3_ref[...],
                preferred_element_type=jnp.float32) + b3_ref[...]     # bn3(conv3)
    out_ref[...] = jnp.max(h.reshape(tm, p, PT_OUT_PAD), axis=1)      # global max pool


def pointnet_feat(points, params):
    """points: (M, P, 3) channels-last.  Returns (M, PT_OUT) global features."""
    M, P, _ = points.shape
    w1, b1, w2b, b2, w3b, b3 = params        # w2b/w3b pre-cast bf16, w3/b3 lane-padded
    # >=2 grid tiles when possible (lets megacore shard the loop across both TCs);
    # TM capped so the f32/bf16 intermediates stay well within v5e/v7x VMEM budgets.
    tm = min(64, max(8, _round_up(pl.cdiv(M, 2), 8)))
    m_pad = _round_up(M, tm)
    if m_pad != M:
        points = jnp.pad(points, ((0, m_pad - M), (0, 0), (0, 0)))
    out = pl.pallas_call(
        functools.partial(_pointnet_kernel, tm=tm, p=P),
        out_shape=jax.ShapeDtypeStruct((m_pad, PT_OUT_PAD), jnp.float32),
        grid=(m_pad // tm,),
        in_specs=[
            pl.BlockSpec((tm, P, 3), lambda i: (i, 0, 0)),
            pl.BlockSpec(w1.shape, lambda i: (0, 0)),
            pl.BlockSpec(b1.shape, lambda i: (0, 0)),
            pl.BlockSpec(w2b.shape, lambda i: (0, 0)),
            pl.BlockSpec(b2.shape, lambda i: (0, 0)),
            pl.BlockSpec(w3b.shape, lambda i: (0, 0)),
            pl.BlockSpec(b3.shape, lambda i: (0, 0)),
        ],
        out_specs=pl.BlockSpec((tm, PT_OUT_PAD), lambda i: (i, 0)),
        compiler_params=pltpu.CompilerParams(
            dimension_semantics=("parallel",),
            vmem_limit_bytes=32 * 1024 * 1024),
    )(points, w1, b1, w2b, b2, w3b, b3)
    return out[:M, :PT_OUT]


# ======================= kernel 2: GATEncoder (fused q+t) ====================
def _gat_kernel(x_ref, adj_ref, ea_ref, w0_ref, wl_ref, asrc_ref, adst_ref,
                we_ref, out_ref, *, num_layers, dim, g, n, e):
    fin = x_ref.shape[-1]
    x = x_ref[...].reshape(g * n, fin)                               # (G*N, Fin)
    adj = adj_ref[...]                                               # (G, N, N)
    # edge-attr -> scalar attention bias, fused (VPU/XLU reduce; no extra XLA op)
    ea = ea_ref[...].reshape(g * n, n, e)
    elog = jnp.sum(ea * we_ref[0], axis=-1).reshape(g, n, n)         # (G, N, N)

    h = jnp.dot(x, w0_ref[...], preferred_element_type=jnp.float32)  # input projection
    parts = [h.reshape(g, n, dim)]
    for l in range(num_layers):                                      # static unroll
        wh = jnp.dot(h, wl_ref[l], preferred_element_type=jnp.float32)     # (G*N, D)
        whg = wh.reshape(g, n, dim)
        s_src = jnp.sum(whg * asrc_ref[l], axis=-1, keepdims=True)         # (G, N, 1)
        s_dst = jnp.sum(whg * adst_ref[l], axis=-1)                        # (G, N)
        logits = s_src + s_dst[:, None, :] + elog                          # (G, N, N)
        logits = jnp.where(logits > 0, logits, 0.2 * logits)               # LeakyReLU(0.2)
        # TODO(synk): nodes with no edges (incl. dense-batch padding) end up with a
        # uniform softmax here instead of being dropped as PyG GATConv would; the
        # wrapper slices padded nodes off so real-node outputs are unaffected.
        logits = jnp.where(adj > 0.5, logits, -1e9)
        logits = logits - jnp.max(logits, axis=-1, keepdims=True)
        p = jnp.exp(logits)
        attn = p / jnp.sum(p, axis=-1, keepdims=True)
        hg = jnp.einsum("gnm,gmd->gnd", attn, whg,
                        preferred_element_type=jnp.float32)
        hg = jnp.maximum(hg, 0.0)
        parts.append(hg)
        h = hg.reshape(g * n, dim)
    pad = out_ref.shape[-1] - dim * (num_layers + 1)
    if pad:
        parts.append(jnp.zeros((g, n, pad), jnp.float32))
    out_ref[...] = jnp.concatenate(parts, axis=-1)                   # single lane-dense store


def gat_encoder_pair(x_q, adj_q, ea_q, x_t, adj_t, ea_t, params):
    """Fused GATEncoder over query + target graphs (one pallas_call).

    x_*: (B, N_*, NODE_INPUT_DIM), adj_*: (B, N_*, N_*), ea_*: (B, N_*, N_*, E).
    Returns sg_q: (B, N_q, AFF_D), sg_t: (B, N_t, AFF_D)."""
    B, NQ, F = x_q.shape
    _, NT, _ = x_t.shape
    N = max(8, _round_up(max(NQ, NT), 8))
    x = jnp.concatenate([_pad_axis(x_q, 1, N), _pad_axis(x_t, 1, N)], axis=0)
    adj = jnp.concatenate([_pad_axis(_pad_axis(adj_q, 1, N), 2, N),
                           _pad_axis(_pad_axis(adj_t, 1, N), 2, N)], axis=0)
    ea = jnp.concatenate([_pad_axis(_pad_axis(ea_q, 1, N), 2, N),
                          _pad_axis(_pad_axis(ea_t, 1, N), 2, N)], axis=0)
    G = 2 * B
    w0, wl, asrc, adst, we = params
    kern = functools.partial(_gat_kernel, num_layers=SG_NUM_LAYERS,
                             dim=SG_INPUT_DIM, g=G, n=N, e=EDGE_INPUT_DIM)
    out = pl.pallas_call(
        kern,
        out_shape=jax.ShapeDtypeStruct((G, N, GAT_OUT_PAD), jnp.float32),
        grid=(1,),
        in_specs=[
            pl.BlockSpec((G, N, F), lambda i: (0, 0, 0)),
            pl.BlockSpec((G, N, N), lambda i: (0, 0, 0)),
            pl.BlockSpec((G, N, N, EDGE_INPUT_DIM), lambda i: (0, 0, 0, 0)),
            pl.BlockSpec(w0.shape, lambda i: (0, 0)),
            pl.BlockSpec(wl.shape, lambda i: (0, 0, 0)),
            pl.BlockSpec(asrc.shape, lambda i: (0, 0)),
            pl.BlockSpec(adst.shape, lambda i: (0, 0)),
            pl.BlockSpec(we.shape, lambda i: (0, 0)),
        ],
        out_specs=pl.BlockSpec((G, N, GAT_OUT_PAD), lambda i: (0, 0, 0)),
        compiler_params=pltpu.CompilerParams(dimension_semantics=("arbitrary",)),
    )(x, adj, ea, w0, wl, asrc, adst, we)
    return out[:B, :NQ, :AFF_D], out[B:, :NT, :AFF_D]


# ======== kernel 3: Affinity + InstanceNorm2d + sinkhorn_rpm =================
def _match_kernel(xq_ref, xt_ref, a_ref, gb_ref, out_ref, *, nq, nt, n_iters):
    xq = xq_ref[...]                                   # (B, nq+1, Dp) last row = slack
    xt = xt_ref[...]                                   # (B, nt+1, Dp)
    b, nq1, dp = xq.shape
    # Affinity Xq A Xt^T (lane-padded to Dp=128; zero pads contribute nothing).
    xqa = jnp.dot(xq.reshape(b * nq1, dp), a_ref[...],
                  preferred_element_type=jnp.float32).reshape(b, nq1, dp)
    m = jnp.einsum("bqd,btd->bqt", xqa, xt, preferred_element_type=jnp.float32)

    rows = lax.broadcasted_iota(jnp.int32, m.shape, 1)
    cols = lax.broadcasted_iota(jnp.int32, m.shape, 2)
    inner = (rows < nq) & (cols < nt)

    # InstanceNorm2d(1, affine=True) over the (nq, nt) score map (pre-slack stats),
    # slack entries then set to log(1)=0 as sinkhorn_rpm's ZeroPad2d would.
    cnt = float(nq * nt)

    def _sum_hw(v):
        return jnp.sum(jnp.sum(v, axis=2, keepdims=True), axis=1, keepdims=True)

    mean = _sum_hw(jnp.where(inner, m, 0.0)) / cnt
    var = _sum_hw(jnp.where(inner, (m - mean) ** 2, 0.0)) / cnt
    gam = gb_ref[0]
    bet = gb_ref[1]
    la = jnp.where(inner, gam * (m - mean) * lax.rsqrt(var + 1e-5) + bet, 0.0)

    # sinkhorn_rpm: log-domain Sinkhorn with slack row/col (slack excluded from its
    # own normalisation but included in the sums).  Fixed iters, statically unrolled.
    for _ in range(n_iters):
        mx = jnp.max(la, axis=2, keepdims=True)
        lse = mx + jnp.log(jnp.sum(jnp.exp(la - mx), axis=2, keepdims=True))
        la = jnp.where(rows < nq, la - lse, la)
        mx = jnp.max(la, axis=1, keepdims=True)
        lse = mx + jnp.log(jnp.sum(jnp.exp(la - mx), axis=1, keepdims=True))
        la = jnp.where(cols < nt, la - lse, la)

    out_ref[...] = jnp.exp(la)


def sg_match(sg_q_pad, sg_t_pad, aff_a_pad, gamma_beta, n_iters):
    B, nq1, Dp = sg_q_pad.shape
    _, nt1, _ = sg_t_pad.shape
    kern = functools.partial(_match_kernel, nq=nq1 - 1, nt=nt1 - 1, n_iters=n_iters)
    return pl.pallas_call(
        kern,
        out_shape=jax.ShapeDtypeStruct((B, nq1, nt1), jnp.float32),
        grid=(1,),
        in_specs=[
            pl.BlockSpec((B, nq1, Dp), lambda i: (0, 0, 0)),
            pl.BlockSpec((B, nt1, Dp), lambda i: (0, 0, 0)),
            pl.BlockSpec(aff_a_pad.shape, lambda i: (0, 0)),
            pl.BlockSpec(memory_space=pltpu.MemorySpace.SMEM),   # [gamma, beta]
        ],
        out_specs=pl.BlockSpec((B, nq1, nt1), lambda i: (0, 0, 0)),
        compiler_params=pltpu.CompilerParams(dimension_semantics=("arbitrary",)),
    )(sg_q_pad, sg_t_pad, aff_a_pad, gamma_beta)


# ============================ parameter init =================================
def init_params(key):
    ks = jax.random.split(key, 16)

    def w(k, shape, scale=0.1):
        return scale * jax.random.normal(k, shape, jnp.float32)

    # --- PointNetfeat: Conv1d(3,64,1)/Conv1d(64,128,1)/Conv1d(128,200,1), eval-mode
    # BatchNorm folded into the per-point linears.
    # TODO(synk): fold assumes synthetic running stats (mean=0, var=1); real trained
    # BN needs scale=gamma/sqrt(running_var+eps), shift=beta-running_mean*scale.
    def fold_bn(wc, bc, gamma, beta, eps=1e-5):
        scale = gamma / jnp.sqrt(1.0 + eps)
        return wc * scale[None, :], (bc * scale + beta)[None, :]

    w1, b1 = fold_bn(w(ks[0], (3, 64)), w(ks[1], (64,), 0.01),
                     jnp.ones((64,)), jnp.zeros((64,)))
    w2, b2 = fold_bn(w(ks[2], (64, 128)), w(ks[3], (128,), 0.01),
                     jnp.ones((128,)), jnp.zeros((128,)))
    w3, b3 = fold_bn(w(ks[4], (128, PT_OUT)), w(ks[5], (PT_OUT,), 0.01),
                     jnp.ones((PT_OUT,)), jnp.zeros((PT_OUT,)))
    # lane-pad the last linear 200 -> 256 (extra channels are zero; sliced off later)
    w3 = jnp.pad(w3, ((0, 0), (0, PT_OUT_PAD - PT_OUT)))
    b3 = jnp.pad(b3, ((0, 0), (0, PT_OUT_PAD - PT_OUT)))
    # bf16 operands for the K=64 / K=128 matmuls, cast once at init (f32 MXU acc).
    w2b = w2.astype(jnp.bfloat16)
    w3b = w3.astype(jnp.bfloat16)

    # --- GATEncoder (synthetic single-head GAT; output = concat of L+1 stages)
    gat = (
        w(ks[6], (NODE_INPUT_DIM, SG_INPUT_DIM)),                 # input projection
        w(ks[7], (SG_NUM_LAYERS, SG_INPUT_DIM, SG_INPUT_DIM)),    # per-layer W
        w(ks[8], (SG_NUM_LAYERS, SG_INPUT_DIM)),                  # a_src
        w(ks[9], (SG_NUM_LAYERS, SG_INPUT_DIM)),                  # a_dst
        w(ks[10], (1, EDGE_INPUT_DIM)),                           # edge-attr -> logit
    )

    # --- Affinity(d = AFF_D) lane-padded to 128, InstanceNorm2d(1, affine=True)
    aff_a = w(ks[11], (AFF_D, AFF_D), 0.05)
    aff_a_pad = jnp.pad(aff_a, ((0, AFF_D_PAD - AFF_D), (0, AFF_D_PAD - AFF_D)))

    return {
        "pointnet": (w1, b1, w2b, b2, w3b, b3),
        "gat": gat,
        "affinity_A_pad": aff_a_pad,
        "in_gamma_beta": jnp.array([1.0, 0.0], jnp.float32),
    }


# ============================== forward ======================================
def sgpgm_pointnet_forward(data, params, *, compute_pt_feats=True):
    # sgfeat_net on query + target graphs, fused into a single kernel launch.
    sg_q, sg_t = gat_encoder_pair(
        data["x_q"], data["adj_q"], data["edge_attr_q"],
        data["x_t"], data["adj_t"], data["edge_attr_t"], params["gat"])

    out = {"sg_feat_q": sg_q, "sg_feat_t": sg_t}

    # object_encoder(cat([ref, src])): computed exactly as in the torch forward, but
    # its result is never fused when use_ptfusion=False, so callers may skip it.
    if compute_pt_feats:
        pts = jnp.concatenate([data["ref_points"], data["src_points"]], axis=0)
        out["pt_feats"] = pointnet_feat(pts, params["pointnet"])   # extra/debug output

    # affinity + InstanceNorm2d + sinkhorn_rpm.  The slack row/col of the padded
    # log_alpha comes from appending a zero embedding row (0 * A * x = 0); the
    # feature/A lane-pad 96 -> 128 does not change Xq A Xt^T.
    B = sg_q.shape[0]

    def _pad_slack(x):
        x = jnp.concatenate([x, jnp.zeros((B, 1, x.shape[-1]), jnp.float32)], axis=1)
        return jnp.pad(x, ((0, 0), (0, 0), (0, AFF_D_PAD - AFF_D)))

    matches_padded = sg_match(_pad_slack(sg_q), _pad_slack(sg_t),
                              params["affinity_A_pad"], params["in_gamma_beta"],
                              SINKHORN_ITERS)
    sg_matches = matches_padded[:, :-1, :-1]
    out["sg_matches_raw"] = sg_matches
    out["sg_matches"] = sg_matches

    # use_topk=False branch: threshold + per-row argmax sparse matches.
    d = jnp.where(sg_matches < DENY_THR, 0.0, sg_matches)
    col_idx = jnp.argmax(d, axis=-1)                                      # (B, nq)
    row_val = jnp.take_along_axis(d, col_idx[..., None], axis=-1)[..., 0]
    # TODO(synk): torch.nonzero yields a dynamically-shaped index list; returned
    # here as a dense (row -> best col, validity-mask) pair instead.
    out["sg_matches_sparse_cols"] = col_idx
    out["sg_matches_sparse_mask"] = row_val > 0
    return out


# ================================ demo =======================================
def _ring_adj(n):
    i = jnp.arange(n)
    d = jnp.abs(i[:, None] - i[None, :])
    d = jnp.minimum(d, n - d)
    return (d <= 1).astype(jnp.float32)          # ring graph + self loops


if __name__ == "__main__":
    key = jax.random.PRNGKey(0)
    params = init_params(key)

    B, NQ, NT, P = 2, 6, 8, NUM_POINTS_IN_PATCH
    k = jax.random.split(key, 8)
    data = {
        # dense-batched scene graphs (to_dense_batch already applied, fixed node count)
        "x_q": jax.random.normal(k[0], (B, NQ, NODE_INPUT_DIM), jnp.float32),
        "x_t": jax.random.normal(k[1], (B, NT, NODE_INPUT_DIM), jnp.float32),
        "adj_q": jnp.broadcast_to(_ring_adj(NQ), (B, NQ, NQ)),
        "adj_t": jnp.broadcast_to(_ring_adj(NT), (B, NT, NT)),
        "edge_attr_q": jax.random.normal(k[2], (B, NQ, NQ, EDGE_INPUT_DIM), jnp.float32),
        "edge_attr_t": jax.random.normal(k[3], (B, NT, NT, EDGE_INPUT_DIM), jnp.float32),
        # one point patch per graph node (flattened across batch, PyG style)
        "ref_points": jax.random.normal(k[4], (B * NQ, P, 3), jnp.float32),
        "src_points": jax.random.normal(k[5], (B * NT, P, 3), jnp.float32),
    }

    out = sgpgm_pointnet_forward(data, params)
    out = jax.block_until_ready(out)

    assert out["sg_matches"].shape == (B, NQ, NT)
    assert out["sg_feat_q"].shape == (B, NQ, AFF_D)
    assert out["sg_feat_t"].shape == (B, NT, AFF_D)
    assert out["pt_feats"].shape == (B * NQ + B * NT, PT_OUT)
    assert bool(jnp.all(jnp.isfinite(out["sg_matches"])))
    assert bool(jnp.all(jnp.isfinite(out["sg_feat_q"])))
    assert bool(jnp.all(jnp.isfinite(out["pt_feats"])))
    print("KERNEL_OK")
</pallas_src>

<mosaic_0001>
module attributes {stable_mosaic.version = 11 : i64} {
  func.func @_gat_kernel(%arg0: i32, %arg1: memref<4x8x16xf32, #tpu.memory_space<vmem>>, %arg2: memref<4x8x8xf32, #tpu.memory_space<vmem>>, %arg3: memref<4x8x8x8xf32, #tpu.memory_space<vmem>>, %arg4: memref<16x32xf32, #tpu.memory_space<vmem>>, %arg5: memref<2x32x32xf32, #tpu.memory_space<vmem>>, %arg6: memref<2x32xf32, #tpu.memory_space<vmem>>, %arg7: memref<2x32xf32, #tpu.memory_space<vmem>>, %arg8: memref<1x8xf32, #tpu.memory_space<vmem>>, %arg9: memref<4x8x128xf32, #tpu.memory_space<vmem>>) attributes {dimension_semantics = [#tpu.dimension_semantics<arbitrary>], iteration_bounds = array<i64: 1>, scalar_prefetch = 0 : i64, scratch_operands = 0 : i64, tpu.core_type = #tpu.core_type<tc>, window_params = [{pipeline_mode = #tpu.pipeline_mode<synchronous>, transform_indices = @transform_0, window_bounds = array<i64: 4, 8, 16>}, {pipeline_mode = #tpu.pipeline_mode<synchronous>, transform_indices = @transform_1, window_bounds = array<i64: 4, 8, 8>}, {pipeline_mode = #tpu.pipeline_mode<synchronous>, transform_indices = @transform_2, window_bounds = array<i64: 4, 8, 8, 8>}, {pipeline_mode = #tpu.pipeline_mode<synchronous>, transform_indices = @transform_3, window_bounds = array<i64: 16, 32>}, {pipeline_mode = #tpu.pipeline_mode<synchronous>, transform_indices = @transform_4, window_bounds = array<i64: 2, 32, 32>}, {pipeline_mode = #tpu.pipeline_mode<synchronous>, transform_indices = @transform_5, window_bounds = array<i64: 2, 32>}, {pipeline_mode = #tpu.pipeline_mode<synchronous>, transform_indices = @transform_6, window_bounds = array<i64: 2, 32>}, {pipeline_mode = #tpu.pipeline_mode<synchronous>, transform_indices = @transform_7, window_bounds = array<i64: 1, 8>}, {pipeline_mode = #tpu.pipeline_mode<synchronous>, transform_indices = @transform_8, window_bounds = array<i64: 4, 8, 128>}]} {
    %c0 = arith.constant 0 : index
    %c0_0 = arith.constant 0 : index
    %c0_1 = arith.constant 0 : index
    %0 = vector.load %arg1[%c0, %c0_0, %c0_1] : memref<4x8x16xf32, #tpu.memory_space<vmem>>, vector<4x8x16xf32>
    %1 = vector.shape_cast %0 : vector<4x8x16xf32> to vector<32x16xf32>
    %c0_2 = arith.constant 0 : index
    %c0_3 = arith.constant 0 : index
    %c0_4 = arith.constant 0 : index
    %2 = vector.load %arg2[%c0_2, %c0_3, %c0_4] : memref<4x8x8xf32, #tpu.memory_space<vmem>>, vector<4x8x8xf32>
    %c0_5 = arith.constant 0 : index
    %c0_6 = arith.constant 0 : index
    %c0_7 = arith.constant 0 : index
    %c0_8 = arith.constant 0 : index
    %3 = vector.load %arg3[%c0_5, %c0_6, %c0_7, %c0_8] : memref<4x8x8x8xf32, #tpu.memory_space<vmem>>, vector<4x8x8x8xf32>
    %4 = vector.shape_cast %3 : vector<4x8x8x8xf32> to vector<32x8x8xf32>
    %c0_9 = arith.constant 0 : index
    %c0_10 = arith.constant 0 : index
    %5 = vector.load %arg8[%c0_9, %c0_10] : memref<1x8xf32, #tpu.memory_space<vmem>>, vector<1x8xf32>
    %6 = vector.shape_cast %5 : vector<1x8xf32> to vector<8xf32>
    %7 = vector.shape_cast %6 : vector<8xf32> to vector<1x1x8xf32>
    %8 = vector.broadcast %7 : vector<1x1x8xf32> to vector<32x8x8xf32>
    %9 = arith.mulf %4, %8 : vector<32x8x8xf32>
    %cst = arith.constant dense<0.000000e+00> : vector<32x8xf32>
    %10 = vector.multi_reduction <add>, %9, %cst [2] : vector<32x8x8xf32> to vector<32x8xf32>
    %11 = vector.shape_cast %10 : vector<32x8xf32> to vector<4x8x8xf32>
    %c0_11 = arith.constant 0 : index
    %c0_12 = arith.constant 0 : index
    %12 = vector.load %arg4[%c0_11, %c0_12] : memref<16x32xf32, #tpu.memory_space<vmem>>, vector<16x32xf32>
    %cst_13 = arith.constant dense<0.000000e+00> : vector<32x32xf32>
    %13 = tpu.matmul %1, %12, %cst_13 {dimension_numbers = #tpu.dot_dimension_numbers<[1], [0], [0], [1], [0, 0, 1, 1], [], []>} : vector<32x16xf32>, vector<16x32xf32>, vector<32x32xf32> -> vector<32x32xf32>
    %14 = vector.shape_cast %13 : vector<32x32xf32> to vector<4x8x32xf32>
    %c0_14 = arith.constant 0 : index
    %c0_15 = arith.constant 0 : index
    %c0_16 = arith.constant 0 : index
    %15 = vector.load %arg5[%c0_14, %c0_15, %c0_16] : memref<2x32x32xf32, #tpu.memory_space<vmem>>, vector<1x32x32xf32>
    %16 = vector.shape_cast %15 : vector<1x32x32xf32> to vector<32x32xf32>
    %cst_17 = arith.constant dense<0.000000e+00> : vector<32x32xf32>
    %17 = tpu.matmul %13, %16, %cst_17 {dimension_numbers = #tpu.dot_dimension_numbers<[1], [0], [0], [1], [0, 0, 1, 1], [], []>} : vector<32x32xf32>, vector<32x32xf32>, vector<32x32xf32> -> vector<32x32xf32>
    %18 = vector.shape_cast %17 : vector<32x32xf32> to vector<4x8x32xf32>
    %c0_18 = arith.constant 0 : index
    %c0_19 = arith.constant 0 : index
    %19 = vector.load %arg6[%c0_18, %c0_19] : memref<2x32xf32, #tpu.memory_space<vmem>>, vector<1x32xf32>
    %20 = vector.shape_cast %19 : vector<1x32xf32> to vector<32xf32>
    %21 = vector.shape_cast %20 : vector<32xf32> to vector<1x1x32xf32>
    %22 = vector.broadcast %21 : vector<1x1x32xf32> to vector<4x8x32xf32>
    %23 = arith.mulf %18, %22 : vector<4x8x32xf32>
    %cst_20 = arith.constant dense<0.000000e+00> : vector<4x8xf32>
    %24 = vector.multi_reduction <add>, %23, %cst_20 [2] : vector<4x8x32xf32> to vector<4x8xf32>
    %25 = vector.shape_cast %24 : vector<4x8xf32> to vector<4x8x1xf32>
    %c0_21 = arith.constant 0 : index
    %c0_22 = arith.constant 0 : index
    %26 = vector.load %arg7[%c0_21, %c0_22] : memref<2x32xf32, #tpu.memory_space<vmem>>, vector<1x32xf32>
    %27 = vector.shape_cast %26 : vector<1x32xf32> to vector<32xf32>
    %28 = vector.shape_cast %27 : vector<32xf32> to vector<1x1x32xf32>
    %29 = vector.broadcast %28 : vector<1x1x32xf32> to vector<4x8x32xf32>
    %30 = arith.mulf %18, %29 : vector<4x8x32xf32>
    %cst_23 = arith.constant dense<0.000000e+00> : vector<4x8xf32>
    %31 = vector.multi_reduction <add>, %30, %cst_23 [2] : vector<4x8x32xf32> to vector<4x8xf32>
    %32 = vector.shape_cast %31 : vector<4x8xf32> to vector<4x1x8xf32>
    %33 = vector.broadcast %25 : vector<4x8x1xf32> to vector<4x8x8xf32>
    %34 = vector.broadcast %32 : vector<4x1x8xf32> to vector<4x8x8xf32>
    %35 = arith.addf %33, %34 : vector<4x8x8xf32>
    %36 = arith.addf %35, %11 : vector<4x8x8xf32>
    %cst_24 = arith.constant 0.000000e+00 : f32
    %37 = vector.broadcast %cst_24 : f32 to vector<4x8x8xf32>
    %38 = arith.cmpf ogt, %36, %37 : vector<4x8x8xf32>
    %cst_25 = arith.constant 2.000000e-01 : f32
    %39 = vector.broadcast %cst_25 : f32 to vector<4x8x8xf32>
    %40 = arith.mulf %39, %36 : vector<4x8x8xf32>
    %41 = arith.select %38, %36, %40 : vector<4x8x8xi1>, vector<4x8x8xf32>
    %cst_26 = arith.constant 5.000000e-01 : f32
    %42 = vector.broadcast %cst_26 : f32 to vector<4x8x8xf32>
    %43 = arith.cmpf ogt, %2, %42 : vector<4x8x8xf32>
    %cst_27 = arith.constant -1.000000e+09 : f32
    %44 = vector.broadcast %cst_27 : f32 to vector<4x8x8xf32>
    %45 = arith.select %43, %41, %44 : vector<4x8x8xi1>, vector<4x8x8xf32>
    %cst_28 = arith.constant dense<0xFF800000> : vector<4x8xf32>
    %46 = vector.multi_reduction <maximumf>, %45, %cst_28 [2] : vector<4x8x8xf32> to vector<4x8xf32>
    %47 = vector.shape_cast %46 : vector<4x8xf32> to vector<4x8x1xf32>
    %48 = vector.broadcast %47 : vector<4x8x1xf32> to vector<4x8x8xf32>
    %49 = arith.subf %45, %48 : vector<4x8x8xf32>
    %50 = math.exp %49 : vector<4x8x8xf32>
    %cst_29 = arith.constant dense<0.000000e+00> : vector<4x8xf32>
    %51 = vector.multi_reduction <add>, %50, %cst_29 [2] : vector<4x8x8xf32> to vector<4x8xf32>
    %52 = vector.shape_cast %51 : vector<4x8xf32> to vector<4x8x1xf32>
    %53 = vector.broadcast %52 : vector<4x8x1xf32> to vector<4x8x8xf32>
    %54 = arith.divf %50, %53 : vector<4x8x8xf32>
    "tpu.trace_start"() <{level = 10 : i32, message = "gnm,gmd->gnd"}> : () -> ()
    %cst_30 = arith.constant dense<0.000000e+00> : vector<4x8x32xf32>
    %55 = tpu.matmul %54, %18, %cst_30 {dimension_numbers = #tpu.dot_dimension_numbers<[2], [1], [1], [2], [0, 0, 0, 1, 1, 2], [0], [0]>} : vector<4x8x8xf32>, vector<4x8x32xf32>, vector<4x8x32xf32> -> vector<4x8x32xf32>
    "tpu.trace_stop"() : () -> ()
    %cst_31 = arith.constant 0.000000e+00 : f32
    %56 = vector.broadcast %cst_31 : f32 to vector<4x8x32xf32>
    %57 = arith.maximumf %55, %56 : vector<4x8x32xf32>
    %58 = vector.shape_cast %57 : vector<4x8x32xf32> to vector<32x32xf32>
    %c1 = arith.constant 1 : index
    %c0_32 = arith.constant 0 : index
    %c0_33 = arith.constant 0 : index
    %59 = vector.load %arg5[%c1, %c0_32, %c0_33] : memref<2x32x32xf32, #tpu.memory_space<vmem>>, vector<1x32x32xf32>
    %60 = vector.shape_cast %59 : vector<1x32x32xf32> to vector<32x32xf32>
    %cst_34 = arith.constant dense<0.000000e+00> : vector<32x32xf32>
    %61 = tpu.matmul %58, %60, %cst_34 {dimension_numbers = #tpu.dot_dimension_numbers<[1], [0], [0], [1], [0, 0, 1, 1], [], []>} : vector<32x32xf32>, vector<32x32xf32>, vector<32x32xf32> -> vector<32x32xf32>
    %62 = vector.shape_cast %61 : vector<32x32xf32> to vector<4x8x32xf32>
    %c1_35 = arith.constant 1 : index
    %c0_36 = arith.constant 0 : index
    %63 = vector.load %arg6[%c1_35, %c0_36] : memref<2x32xf32, #tpu.memory_space<vmem>>, vector<1x32xf32>
    %64 = vector.shape_cast %63 : vector<1x32xf32> to vector<32xf32>
    %65 = vector.shape_cast %64 : vector<32xf32> to vector<1x1x32xf32>
    %66 = vector.broadcast %65 : vector<1x1x32xf32> to vector<4x8x32xf32>
    %67 = arith.mulf %62, %66 : vector<4x8x32xf32>
    %cst_37 = arith.constant dense<0.000000e+00> : vector<4x8xf32>
    %68 = vector.multi_reduction <add>, %67, %cst_37 [2] : vector<4x8x32xf32> to vector<4x8xf32>
    %69 = vector.shape_cast %68 : vector<4x8xf32> to vector<4x8x1xf32>
    %c1_38 = arith.constant 1 : index
    %c0_39 = arith.constant 0 : index
    %70 = vector.load %arg7[%c1_38, %c0_39] : memref<2x32xf32, #tpu.memory_space<vmem>>, vector<1x32xf32>
    %71 = vector.shape_cast %70 : vector<1x32xf32> to vector<32xf32>
    %72 = vector.shape_cast %71 : vector<32xf32> to vector<1x1x32xf32>
    %73 = vector.broadcast %72 : vector<1x1x32xf32> to vector<4x8x32xf32>
    %74 = arith.mulf %62, %73 : vector<4x8x32xf32>
    %cst_40 = arith.constant dense<0.000000e+00> : vector<4x8xf32>
    %75 = vector.multi_reduction <add>, %74, %cst_40 [2] : vector<4x8x32xf32> to vector<4x8xf32>
    %76 = vector.shape_cast %75 : vector<4x8xf32> to vector<4x1x8xf32>
    %77 = vector.broadcast %69 : vector<4x8x1xf32> to vector<4x8x8xf32>
    %78 = vector.broadcast %76 : vector<4x1x8xf32> to vector<4x8x8xf32>
    %79 = arith.addf %77, %78 : vector<4x8x8xf32>
    %80 = arith.addf %79, %11 : vector<4x8x8xf32>
    %cst_41 = arith.constant 0.000000e+00 : f32
    %81 = vector.broadcast %cst_41 : f32 to vector<4x8x8xf32>
    %82 = arith.cmpf ogt, %80, %81 : vector<4x8x8xf32>
    %cst_42 = arith.constant 2.000000e-01 : f32
    %83 = vector.broadcast %cst_42 : f32 to vector<4x8x8xf32>
    %84 = arith.mulf %83, %80 : vector<4x8x8xf32>
    %85 = arith.select %82, %80, %84 : vector<4x8x8xi1>, vector<4x8x8xf32>
    %cst_43 = arith.constant 5.000000e-01 : f32
    %86 = vector.broadcast %cst_43 : f32 to vector<4x8x8xf32>
    %87 = arith.cmpf ogt, %2, %86 : vector<4x8x8xf32>
    %cst_44 = arith.constant -1.000000e+09 : f32
    %88 = vector.broadcast %cst_44 : f32 to vector<4x8x8xf32>
    %89 = arith.select %87, %85, %88 : vector<4x8x8xi1>, vector<4x8x8xf32>
    %cst_45 = arith.constant dense<0xFF800000> : vector<4x8xf32>
    %90 = vector.multi_reduction <maximumf>, %89, %cst_45 [2] : vector<4x8x8xf32> to vector<4x8xf32>
    %91 = vector.shape_cast %90 : vector<4x8xf32> to vector<4x8x1xf32>
    %92 = vector.broadcast %91 : vector<4x8x1xf32> to vector<4x8x8xf32>
    %93 = arith.subf %89, %92 : vector<4x8x8xf32>
    %94 = math.exp %93 : vector<4x8x8xf32>
    %cst_46 = arith.constant dense<0.000000e+00> : vector<4x8xf32>
    %95 = vector.multi_reduction <add>, %94, %cst_46 [2] : vector<4x8x8xf32> to vector<4x8xf32>
    %96 = vector.shape_cast %95 : vector<4x8xf32> to vector<4x8x1xf32>
    %97 = vector.broadcast %96 : vector<4x8x1xf32> to vector<4x8x8xf32>
    %98 = arith.divf %94, %97 : vector<4x8x8xf32>
    "tpu.trace_start"() <{level = 10 : i32, message = "gnm,gmd->gnd"}> : () -> ()
    %cst_47 = arith.constant dense<0.000000e+00> : vector<4x8x32xf32>
    %99 = tpu.matmul %98, %62, %cst_47 {dimension_numbers = #tpu.dot_dimension_numbers<[2], [1], [1], [2], [0, 0, 0, 1, 1, 2], [0], [0]>} : vector<4x8x8xf32>, vector<4x8x32xf32>, vector<4x8x32xf32> -> vector<4x8x32xf32>
    "tpu.trace_stop"() : () -> ()
    %cst_48 = arith.constant 0.000000e+00 : f32
    %100 = vector.broadcast %cst_48 : f32 to vector<4x8x32xf32>
    %101 = arith.maximumf %99, %100 : vector<4x8x32xf32>
    %cst_49 = arith.constant 0.000000e+00 : f32
    %102 = vector.broadcast %cst_49 : f32 to vector<4x8x32xf32>
    %103 = tpu.concatenate %14, %57, %101, %102 in 2 : vector<4x8x32xf32>, vector<4x8x32xf32>, vector<4x8x32xf32>, vector<4x8x32xf32> -> vector<4x8x128xf32>
    %c0_50 = arith.constant 0 : index
    %c0_51 = arith.constant 0 : index
    %c0_52 = arith.constant 0 : index
    %104 = vector.load %arg9[%c0_50, %c0_51, %c0_52] : memref<4x8x128xf32, #tpu.memory_space<vmem>>, vector<4x8x128xf32>
    tpu.vector_store %arg9[%c0_50, %c0_51, %c0_52], %103 {strides = array<i32>} : memref<4x8x128xf32, #tpu.memory_space<vmem>>, vector<4x8x128xf32>,
    return
  }
  func.func @transform_0(%arg0: i32) -> (i32, i32, i32) {
    %c0_i32 = arith.constant 0 : i32
    %c0_i32_0 = arith.constant 0 : i32
    %c0_i32_1 = arith.constant 0 : i32
    %c0_i32_2 = arith.constant 0 : i32
    return %c0_i32, %c0_i32_0, %c0_i32_1 : i32, i32, i32
  }
  func.func @transform_1(%arg0: i32) -> (i32, i32, i32) {
    %c0_i32 = arith.constant 0 : i32
    %c0_i32_0 = arith.constant 0 : i32
    %c0_i32_1 = arith.constant 0 : i32
    %c0_i32_2 = arith.constant 0 : i32
    return %c0_i32, %c0_i32_0, %c0_i32_1 : i32, i32, i32
  }
  func.func @transform_2(%arg0: i32) -> (i32, i32, i32, i32) {
    %c0_i32 = arith.constant 0 : i32
    %c0_i32_0 = arith.constant 0 : i32
    %c0_i32_1 = arith.constant 0 : i32
    %c0_i32_2 = arith.constant 0 : i32
    %c0_i32_3 = arith.constant 0 : i32
    return %c0_i32, %c0_i32_0, %c0_i32_1, %c0_i32_2 : i32, i32, i32, i32
  }
  func.func @transform_3(%arg0: i32) -> (i32, i32) {
    %c0_i32 = arith.constant 0 : i32
    %c0_i32_0 = arith.constant 0 : i32
    %c0_i32_1 = arith.constant 0 : i32
    return %c0_i32, %c0_i32_0 : i32, i32
  }
  func.func @transform_4(%arg0: i32) -> (i32, i32, i32) {
    %c0_i32 = arith.constant 0 : i32
    %c0_i32_0 = arith.constant 0 : i32
    %c0_i32_1 = arith.constant 0 : i32
    %c0_i32_2 = arith.constant 0 : i32
    return %c0_i32, %c0_i32_0, %c0_i32_1 : i32, i32, i32
  }
  func.func @transform_5(%arg0: i32) -> (i32, i32) {
    %c0_i32 = arith.constant 0 : i32
    %c0_i32_0 = arith.constant 0 : i32
    %c0_i32_1 = arith.constant 0 : i32
    return %c0_i32, %c0_i32_0 : i32, i32
  }
  func.func @transform_6(%arg0: i32) -> (i32, i32) {
    %c0_i32 = arith.constant 0 : i32
    %c0_i32_0 = arith.constant 0 : i32
    %c0_i32_1 = arith.constant 0 : i32
    return %c0_i32, %c0_i32_0 : i32, i32
  }
  func.func @transform_7(%arg0: i32) -> (i32, i32) {
    %c0_i32 = arith.constant 0 : i32
    %c0_i32_0 = arith.constant 0 : i32
    %c0_i32_1 = arith.constant 0 : i32
    return %c0_i32, %c0_i32_0 : i32, i32
  }
  func.func @transform_8(%arg0: i32) -> (i32, i32, i32) {
    %c0_i32 = arith.constant 0 : i32
    %c0_i32_0 = arith.constant 0 : i32
    %c0_i32_1 = arith.constant 0 : i32
    %c0_i32_2 = arith.constant 0 : i32
    return %c0_i32, %c0_i32_0, %c0_i32_1 : i32, i32, i32
  }
}

</mosaic_0001>

<bundles_post_ra>
// kernel: tpu_custom_call.1
= control target key start
LH: loop header
LB: loop body
LE: loop exit
PB: predicated region body
PF: predicated region fallthrough
CT: control target
= control target key end

     0   :  { %13 = vsyncpa [#allocation3], 0  ;;  %s2551_s0 = inlined_call_operand.hbm [shape: f32[4,8,16], index: 0, kind: input, shape index: {}]   ;;  %s2552_s1 = inlined_call_operand.hbm [shape: f32[4,8,8], index: 1, kind: input, shape index: {}]   ;;  %s2553_s2 = inlined_call_operand.hbm [shape: f32[4,8,8,8], index: 2, kind: input, shape index: {}]   ;;  %s2554_s3 = inlined_call_operand.hbm [shape: f32[16,32], index: 3, kind: input, shape index: {}]   ;;  %s2555_s4 = inlined_call_operand.hbm [shape: f32[2,32,32], index: 4, kind: input, shape index: {}]   ;;  %s2556_s5 = inlined_call_operand.vmem [shape: f32[2,32], index: 5, kind: input, shape index: {}]   ;;  %s2557_s6 = inlined_call_operand.vmem [shape: f32[2,32], index: 6, kind: input, shape index: {}]   ;;  %s2558_s7 = inlined_call_operand.vmem [shape: f32[1,8], index: 7, kind: input, shape index: {}]   ;;  %s2559_s8 = inlined_call_operand.hbm [shape: f32[4,8,128], index: 8, kind: output, shape index: {}]  }
   0x1   :  { %14 = vsyncpa [#allocation6], 0 }
   0x2   :  { %15 = vsyncpa [#allocation9], 0 }
   0x3   :  { %16 = vsyncpa [#allocation4], 0  ;;  %s2069_s27 = smov [#allocation5]   ;;  %s2070_s29 = smov [#allocation8]  }
   0x4   :  { %s34_s28 = sshll.u32 %s2069_s27, 4  ;;  %s58_s30 = sshll.u32 %s2070_s29, 4  ;;  %s35_s28 = int_to_ptr.vmem [resolvable:$true] %s34_s28  ;;  %s59_s30 = int_to_ptr.vmem [resolvable:$true] %s58_s30 }
   0x5   :  { %s1949_s9 = scalar_lea.vmem %s35_s28, 512  ;;  %p1954_p1 = scmp.lt.s32.totalorder %s35_s28, %s35_s28 }
   0x6   :  { %p1950_p0 = scmp.ne.s32.totalorder %s35_s28, %s1949_s9  ;;  %p1955_p2 = scmp.lt.s32.totalorder %s1949_s9, %s1949_s9 }
   0x8   :  { %p1956_p3 = por %p1955_p2, %p1954_p1 }
   0xa   :  { %p1957_p4 = pnand %p1956_p3, %p1950_p0 }
   0xc   :  { %1960 = shalt.err (!%p1957_p4)
}
   0xd   :  { %s2071_s10 = smov 128   ;;  %s2072_s11 = smov 8  }
   0xe   :  { %40 = dma.hbm_to_vmem [thread:$0]  %s2552_s1, 512, %s35_s28, [#allocation6], %s2071_s10, %s2071_s10, %s2072_s11  }
   0xf   :  { %s1969_s14 = scalar_lea.vmem %s59_s30, 256  ;;  %p1974_p6 = scmp.lt.s32.totalorder %s59_s30, %s59_s30 }
  0x10   :  { %p1970_p5 = scmp.ne.s32.totalorder %s59_s30, %s1969_s14  ;;  %p1975_p7 = scmp.lt.s32.totalorder %s1969_s14, %s1969_s14 }
  0x12   :  { %p1976_p8 = por %p1975_p7, %p1974_p6 }
  0x14   :  { %p1977_p9 = pnand %p1976_p8, %p1970_p5 }
  0x16   :  { %1980 = shalt.err (!%p1977_p9)
}
  0x17   :  { %64 = dma.hbm_to_vmem [thread:$0]  %s2554_s3, 256, %s59_s30, [#allocation9], %s2071_s10, %s2071_s10, %s2072_s11  }
  0x18   :  { %s2073_s17 = smov [#allocation2]   ;;  %s2074_s19 = smov [#allocation7]  }
  0x19   :  { %s22_s18 = sshll.u32 %s2073_s17, 4  ;;  %s46_s20 = sshll.u32 %s2074_s19, 4  ;;  %s23_s18 = int_to_ptr.vmem [resolvable:$true] %s22_s18  ;;  %s47_s20 = int_to_ptr.vmem [resolvable:$true] %s46_s20 }
  0x1a   :  { %s1989_s1 = scalar_lea.vmem %s23_s18, 512  ;;  %p1994_p11 = scmp.lt.s32.totalorder %s23_s18, %s23_s18 }
  0x1b   :  { %p1990_p10 = scmp.ne.s32.totalorder %s23_s18, %s1989_s1  ;;  %p1995_p12 = scmp.lt.s32.totalorder %s1989_s1, %s1989_s1 }
  0x1d   :  { %p1996_p13 = por %p1995_p12, %p1994_p11 }
  0x1f   :  { %p1997_p0 = pnand %p1996_p13, %p1990_p10 }
  0x21   :  { %2000 = shalt.err (!%p1997_p0)
}
  0x22   :  { %28 = dma.hbm_to_vmem [thread:$0]  %s2551_s0, 512, %s23_s18, [#allocation3], %s2071_s10, %s2071_s10, %s2072_s11  }
  0x23   :  { %s2009_s3 = scalar_lea.vmem %s47_s20, 4096  ;;  %p2014_p2 = scmp.lt.s32.totalorder %s47_s20, %s47_s20 }
  0x24   :  { %p2010_p1 = scmp.ne.s32.totalorder %s47_s20, %s2009_s3  ;;  %p2015_p3 = scmp.lt.s32.totalorder %s2009_s3, %s2009_s3 }
  0x26   :  { %p2016_p4 = por %p2015_p3, %p2014_p2 }
  0x28   :  { %p2017_p5 = pnand %p2016_p4, %p2010_p1 }
  0x2a   :  { %2020 = shalt.err (!%p2017_p5)
}
  0x2b   :  { %52 = dma.hbm_to_vmem [thread:$0]  %s2553_s2, 4096, %s47_s20, [#allocation6], %s2071_s10, %s2071_s10, %s2072_s11  }
  0x2c   :  { %s2075_s25 = smov [#allocation10]  }
  0x2d   :  { %s70_s26 = sshll.u32 %s2075_s25, 4  ;;  %s71_s26 = int_to_ptr.vmem [resolvable:$true] %s70_s26 }
  0x2e   :  { %s2029_s27 = scalar_lea.vmem %s71_s26, 1024  ;;  %p2034_p7 = scmp.lt.s32.totalorder %s71_s26, %s71_s26 }
  0x2f   :  { %p2030_p6 = scmp.ne.s32.totalorder %s71_s26, %s2029_s27  ;;  %p2035_p8 = scmp.lt.s32.totalorder %s2029_s27, %s2029_s27 }
  0x31   :  { %p2036_p9 = por %p2035_p8, %p2034_p7 }
  0x33   :  { %p2037_p10 = pnand %p2036_p9, %p2030_p6 }
  0x35   :  { %2040 = shalt.err (!%p2037_p10)
}
  0x36   :  { %76 = dma.hbm_to_vmem [thread:$0]  %s2555_s4, 1024, %s71_s26, [#allocation9], %s2071_s10, %s2071_s10, %s2072_s11  }
  0x37   :  { %2061 = dma.done.wait [#allocation3], 512  }
  0x38   :  { %2062 = vsyncadd [#allocation3], 4294966784 }
  0x39   :  { %2063 = dma.done.wait [#allocation6], 4608  }
  0x3a   :  { %2064 = vsyncadd [#allocation6], 4294962688 }
  0x3b   :  { %2065 = dma.done.wait [#allocation9], 1280  }
  0x3c   :  { %2066 = vsyncadd [#allocation9], 4294966016  ;;  %vm276_vm0 = vcmask 130048   ;;  %v275_v0 = vld [vmem:[#allocation8 + $0x8] sm:$0xff]  ;;  %v274_v1 = vld [vmem:[#allocation8] sm:$0xff]  ;;  %vm177_vm1 = vcmask 64512  }
  0x3d   :  { %v98_v2 = vld [vmem:[#allocation2] sm:$0xff]  ;;  %1819 = vmatprep.subr.mxu0 %v275_v0  ;;  %v99_v3 = vld [vmem:[#allocation2 + $0x8] sm:$0xff]  ;;  %v100_v6 = vld [vmem:[#allocation2 + $0x10] sm:$0xff]  ;;  %vm378_vm2 = vcmask 261120   ;;  %vm540_vm3 = vcmask 1041409   ;;  %vm541_vm4 = vcmask 1042434  }
  0x3e   :  { %1823 = vmatprep.mubr.msk.f32.mxu0 %vm276_vm0, %v98_v2  ;;  %1820 = vmatpush3.msra.mxu0 %v275_v0  ;;  %v377_v4 = vld [vmem:[#allocation10 + $0x18] sm:$0xff]  ;;  %v376_v5 = vld [vmem:[#allocation10 + $0x10] sm:$0xff]  ;;  %v101_v7 = vld [vmem:[#allocation2 + $0x18] sm:$0xff]  ;;  %vm543_vm5 = vcmask 1043459   ;;  %vm545_vm6 = vcmask 1044484   ;;  %vm547_vm7 = vcmask 1045509  }
  0x3f   :  { %1821 = vmatprep.subr.mxu0 %v274_v1  ;;  %1829 = vmatprep.subr.mxu1 %v377_v4  ;;  %v375_v8 = vld [vmem:[#allocation10 + $0x8] sm:$0xff]  ;;  %v374_v9 = vld [vmem:[#allocation10] sm:$0xff]  ;;  %v2163_v11 = vld [vmem:[%s2558_s7] ss:$0 sm:$0xff]  ;;  %vm549_vm8 = vcmask 1046534   ;;  %vm551_vm9 = vcmask 1047559  }
  0x40   :  { %1822 = vmatpush3.msra.mxu0 %v274_v1  ;;  %1830 = vmatpush3.msra.mxu1 %v377_v4  ;;  %v108_v10 = vld [vmem:[#allocation7 + $0x10] sm:$0xff]  ;;  %v106_v12 = vld [vmem:[#allocation7] sm:$0xff]  ;;  %v109_v15 = vld [vmem:[#allocation7 + $0x18] sm:$0xff]  ;;  %s2080_s16 = smov [#allocation11]  }
  0x41   :  { %1824 = vmatmul.mubr.msk.f32.vlgmr.msra.gmra.mxu0 %vm276_vm0, %v99_v3  ;;  %1831 = vmatprep.subr.mxu1 %v376_v5  ;;  %v147_v13 = vmul.f32 %v2163_v11, %v108_v10  ;;  %v145_v14 = vmul.f32 %v2163_v11, %v106_v12  ;;  %v107_v16 = vld [vmem:[#allocation7 + $0x8] sm:$0xff]  ;;  %v148_v17 = vmul.f32 %v2163_v11, %v109_v15  ;;  %v110_v20 = vld [vmem:[#allocation7 + $0x20] sm:$0xff]  ;;  %v116_v33 = vld [vmem:[#allocation7 + $0x50] sm:$0xff]  ;;  %s1742_s17 = sshll.u32 %s2080_s16, 4  ;;  %s1743_s17 = int_to_ptr.vmem [resolvable:$true] %s1742_s17 }
  0x42   :  { %1826 = vmatprep.mubr.msk.f32.mxu0 %vm276_vm0, %v100_v6  ;;  %1832 = vmatpush3.msra.mxu1 %v376_v5  ;;  %v146_v18 = vmul.f32 %v2163_v11, %v107_v16  ;;  %v111_v19 = vld [vmem:[#allocation7 + $0x28] sm:$0xff]  ;;  %v149_v26 = vmul.f32 %v2163_v11, %v110_v20  ;;  %v114_v28 = vld [vmem:[#allocation7 + $0x40] sm:$0xff]  ;;  %v112_v34 = vld [vmem:[#allocation7 + $0x30] sm:$0xff]  ;;  %v155_v37 = vmul.f32 %v2163_v11, %v116_v33  ;;  %s2041_s18 = scalar_lea.vmem %s1743_s17, 512  ;;  %p2046_p12 = scmp.lt.s32.totalorder %s1743_s17, %s1743_s17 }
  0x43   :  { %1833 = vmatprep.subr.mxu1 %v375_v8  ;;  %v184_v21 = vsel %vm177_vm1, %v147_v13, 0.0  ;;  %v178_v22 = vsel %vm177_vm1, %v145_v14, 0.0  ;;  %v187_v23 = vsel %vm177_vm1, %v148_v17, 0.0  ;;  %v150_v25 = vmul.f32 %v2163_v11, %v111_v19  ;;  %v115_v27 = vld [vmem:[#allocation7 + $0x48] sm:$0xff]  ;;  %v113_v39 = vld [vmem:[#allocation7 + $0x38] sm:$0xff]  ;;  %v118_v45 = vld [vmem:[#allocation7 + $0x60] sm:$0xff]  ;;  %p2042_p11 = scmp.ne.s32.totalorder %s1743_s17, %s2041_s18  ;;  %p2047_p13 = scmp.lt.s32.totalorder %s2041_s18, %s2041_s18 }
  0x44   :  { %1834 = vmatpush3.msra.mxu1 %v375_v8  ;;  %185 = vadd.xlane.f32.xlu1 %v184_v21  ;;  %v181_v24 = vsel %vm177_vm1, %v146_v18, 0.0  ;;  %v190_v30 = vsel %vm177_vm1, %v149_v26, 0.0  ;;  %v154_v31 = vmul.f32 %v2163_v11, %v115_v27  ;;  %v153_v32 = vmul.f32 %v2163_v11, %v114_v28  ;;  %v117_v40 = vld [vmem:[#allocation7 + $0x58] sm:$0xff]  ;;  %v120_v46 = vld [vmem:[#allocation7 + $0x70] sm:$0xff]  ;;  %v119_v51 = vld [vmem:[#allocation7 + $0x68] sm:$0xff] }
  0x45   :  { %1827 = vmatmul.mubr.msk.f32.gmra.mxu0 %vm276_vm0, %v101_v7  ;;  %1835 = vmatprep.subr.mxu1 %v374_v9  ;;  %v193_v29 = vsel %vm177_vm1, %v150_v25, 0.0  ;;  %v151_v38 = vmul.f32 %v2163_v11, %v112_v34  ;;  %v208_v41 = vsel %vm177_vm1, %v155_v37, 0.0  ;;  %v152_v43 = vmul.f32 %v2163_v11, %v113_v39  ;;  %v121_v52 = vld [vmem:[#allocation7 + $0x78] sm:$0xff]  ;;  %v122_v57 = vld [vmem:[#allocation7 + $0x80] sm:$0xff]  ;;  %v123_v58 = vld [vmem:[#allocation7 + $0x88] sm:$0xff]  ;;  %p2048_p0 = por %p2047_p13, %p2046_p12 }
  0x46   :  { %1836 = vmatpush3.msra.mxu1 %v374_v9  ;;  %179 = vadd.xlane.f32.xlu0 %v178_v22  ;;  %v205_v35 = vsel %vm177_vm1, %v154_v31, 0.0  ;;  %v202_v36 = vsel %vm177_vm1, %v153_v32, 0.0  ;;  %v156_v44 = vmul.f32 %v2163_v11, %v117_v40  ;;  %v157_v49 = vmul.f32 %v2163_v11, %v118_v45  ;;  %v130_v63 = vld [vmem:[#allocation7 + $0xc0] sm:$0xff]  ;;  %v124_v0 = vld [vmem:[#allocation7 + $0x90] sm:$0xff]  ;;  %v125_v5 = vld [vmem:[#allocation7 + $0x98] sm:$0xff] }
  0x47   :  { %v196_v42 = vsel %vm177_vm1, %v151_v38, 0.0  ;;  %v199_v47 = vsel %vm177_vm1, %v152_v43, 0.0  ;;  %v159_v50 = vmul.f32 %v2163_v11, %v120_v46  ;;  %v158_v55 = vmul.f32 %v2163_v11, %v119_v51  ;;  %v131_v6 = vld [vmem:[#allocation7 + $0xc8] sm:$0xff]  ;;  %v126_v12 = vld [vmem:[#allocation7 + $0xa0] sm:$0xff]  ;;  %v132_v13 = vld [vmem:[#allocation7 + $0xd0] sm:$0xff]  ;;  %p2049_p1 = pnand %p2048_p0, %p2042_p11 }
  0x48   :  { %188 = vadd.xlane.f32.xlu1 %v187_v23  ;;  %v211_v48 = vsel %vm177_vm1, %v156_v44, 0.0  ;;  %v214_v53 = vsel %vm177_vm1, %v157_v49, 0.0  ;;  %v160_v56 = vmul.f32 %v2163_v11, %v121_v52  ;;  %v161_v61 = vmul.f32 %v2163_v11, %v122_v57  ;;  %v127_v18 = vld [vmem:[#allocation7 + $0xa8] sm:$0xff]  ;;  %v133_v19 = vld [vmem:[#allocation7 + $0xd8] sm:$0xff]  ;;  %v134_v25 = vld [vmem:[#allocation7 + $0xe0] sm:$0xff] }
  0x49   :  { %v220_v54 = vsel %vm177_vm1, %v159_v50, 0.0  ;;  %v217_v59 = vsel %vm177_vm1, %v158_v55, 0.0  ;;  %v162_v62 = vmul.f32 %v2163_v11, %v123_v58  ;;  %v169_v3 = vmul.f32 %v2163_v11, %v130_v63  ;;  %v1766_v40 = vld [vmem:[%s2557_s6] ss:$0 sm:$0xff]  ;;  %v136_v45 = vld [vmem:[#allocation7 + $0xf0] sm:$0xff]  ;;  %v129_v50 = vld [vmem:[#allocation7 + $0xb8] sm:$0xff] }
  0x4a   :  { %182 = vadd.xlane.f32.xlu0 %v181_v24  ;;  %v223_v60 = vsel %vm177_vm1, %v160_v56, 0.0  ;;  %v226_v1 = vsel %vm177_vm1, %v161_v61, 0.0  ;;  %v163_v4 = vmul.f32 %v2163_v11, %v124_v0  ;;  %v164_v9 = vmul.f32 %v2163_v11, %v125_v5  ;;  %v128_v24 = vld [vmem:[#allocation7 + $0xb0] sm:$0xff]  ;;  %v137_v55 = vld [vmem:[#allocation7 + $0xf8] sm:$0xff] }
  0x4b   :  { %v229_v2 = vsel %vm177_vm1, %v162_v62, 0.0  ;;  %v250_v7 = vsel %vm177_vm1, %v169_v3, 0.0  ;;  %v170_v10 = vmul.f32 %v2163_v11, %v131_v6  ;;  %v165_v16 = vmul.f32 %v2163_v11, %v126_v12 }
  0x4c   :  { %194 = vadd.xlane.f32.xlu1 %v193_v29  ;;  %v232_v8 = vsel %vm177_vm1, %v163_v4, 0.0  ;;  %v235_v14 = vsel %vm177_vm1, %v164_v9, 0.0  ;;  %v171_v17 = vmul.f32 %v2163_v11, %v132_v13  ;;  %v166_v22 = vmul.f32 %v2163_v11, %v127_v18 }
  0x4d   :  { %v253_v15 = vsel %vm177_vm1, %v170_v10, 0.0  ;;  %v238_v20 = vsel %vm177_vm1, %v165_v16, 0.0  ;;  %v172_v23 = vmul.f32 %v2163_v11, %v133_v19  ;;  %v167_v28 = vmul.f32 %v2163_v11, %v128_v24 }
  0x4e   :  { %191 = vadd.xlane.f32.xlu0 %v190_v30  ;;  %v256_v21 = vsel %vm177_vm1, %v171_v17, 0.0  ;;  %v241_v26 = vsel %vm177_vm1, %v166_v22, 0.0  ;;  %v173_v29 = vmul.f32 %v2163_v11, %v134_v25  ;;  %v135_v30 = vld [vmem:[#allocation7 + $0xe8] sm:$0xff]  ;;  %v2076_v39 = vmov 0.0  }
  0x4f   :  { %v259_v27 = vsel %vm177_vm1, %v172_v23, 0.0  ;;  %v244_v31 = vsel %vm177_vm1, %v167_v28, 0.0  ;;  %v174_v33 = vmul.f32 %v2163_v11, %v135_v30  ;;  %1843 = vmatprep.subr.mxu0 %v2076_v39  ;;  %1853 = vmatprep.subr.mxu1 %v2076_v39  ;;  %v168_v57 = vmul.f32 %v2163_v11, %v129_v50 }
  0x50   :  { %206 = vadd.xlane.f32.xlu1 %v205_v35  ;;  %v262_v32 = vsel %vm177_vm1, %v173_v29, 0.0 }
  0x51   :  { %v265_v34 = vsel %vm177_vm1, %v174_v33, 0.0  ;;  %v247_v61 = vsel %vm177_vm1, %v168_v57, 0.0 }
  0x52   :  { %203 = vadd.xlane.f32.xlu0 %v202_v36 }
  0x54   :  { %209 = vadd.xlane.f32.xlu1 %v208_v41 }
  0x56   :  { %197 = vadd.xlane.f32.xlu0 %v196_v42  ;;  %v1765_v42 = vld [vmem:[%s2556_s5] ss:$0 sm:$0xff] }
  0x58   :  { %200 = vadd.xlane.f32.xlu1 %v199_v47 }
  0x5a   :  { %212 = vadd.xlane.f32.xlu0 %v211_v48 }
  0x5c   :  { %215 = vadd.xlane.f32.xlu1 %v214_v53  ;;  %v175_v53 = vmul.f32 %v2163_v11, %v136_v45 }
  0x5e   :  { %221 = vadd.xlane.f32.xlu0 %v220_v54 }
  0x60   :  { %218 = vadd.xlane.f32.xlu1 %v217_v59  ;;  %v268_v59 = vsel %vm177_vm1, %v175_v53, 0.0 }
  0x62   :  { %224 = vadd.xlane.f32.xlu0 %v223_v60  ;;  %v176_v60 = vmul.f32 %v2163_v11, %v137_v55 }
  0x64   :  { %227 = vadd.xlane.f32.xlu1 %v226_v1  ;;  %v271_v62 = vsel %vm177_vm1, %v176_v60, 0.0 }
  0x66   :  { %230 = vadd.xlane.f32.xlu0 %v229_v2 }
  0x68   :  { %251 = vadd.xlane.f32.xlu1 %v250_v7 }
  0x6a   :  { %233 = vadd.xlane.f32.xlu0 %v232_v8 }
  0x6c   :  { %236 = vadd.xlane.f32.xlu1 %v235_v14 }
  0x6e   :  { %254 = vadd.xlane.f32.xlu0 %v253_v15 }
  0x70   :  { %239 = vadd.xlane.f32.xlu1 %v238_v20 }
  0x72   :  { %257 = vadd.xlane.f32.xlu0 %v256_v21 }
  0x74   :  { %242 = vadd.xlane.f32.xlu1 %v241_v26 }
  0x76   :  { %260 = vadd.xlane.f32.xlu0 %v259_v27  ;;  %v522_v27 = vlaneseq }
  0x78   :  { %245 = vadd.xlane.f32.xlu1 %v244_v31  ;;  %v523_v29 = vand.u32 127, %v522_v27  ;;  %v525_v30 = vshrl.u32 %v522_v27, 7  ;;  %v2347_v27 = vld [vmem:[#allocation5 + $0x8] sm:$0xff] }
  0x79   :  { %vm788_vm11 = vcmp.gt.f32.partialorder %v2347_v27, 0.5 }
  0x7a   :  { %263 = vadd.xlane.f32.xlu0 %v262_v32  ;;  %v2286_v33 = vsub.s32 %v523_v29, %v525_v30 }
  0x7e   :  { %266 = vadd.xlane.f32.xlu0 %v265_v34 }
  0xcd   :  { %v186_v7 = vpop.xlane.xlu1 %185 }
  0xcf   :  { %v180_v6 = vpop.xlane.xlu0 %179 }
  0xd1   :  { %v189_v9 = vpop.xlane.xlu1 %188 }
  0xd3   :  { %v183_v8 = vpop.xlane.xlu0 %182 }
  0xd5   :  { %v195_v12 = vpop.xlane.xlu1 %194 }
  0xd7   :  { %v192_v10 = vpop.xlane.xlu0 %191 }
  0xd9   :  { %v207_v14 = vpop.xlane.xlu1 %206 }
  0xda   :  { %v650_v34 = vrot.slane %v207_v14, %v2286_v33 }
  0xdb   :  { %v204_v13 = vpop.xlane.xlu0 %203 }
  0xdd   :  { %v210_v16 = vpop.xlane.xlu1 %209 }
  0xdf   :  { %v2270_v15 = vpop.xlane.xlu0 %197 }
  0xe1   :  { %v2272_v18 = vpop.xlane.xlu1 %200 }
  0xe3   :  { %v213_v17 = vpop.xlane.xlu0 %212 }
  0xe5   :  { %v216_v20 = vpop.xlane.xlu1 %215 }
  0xe6   :  { %v662_v57 = vrot.slane %v216_v20, %v2286_v33 }
  0xe7   :  { %v222_v19 = vpop.xlane.xlu0 %221 }
  0xe9   :  { %v219_v22 = vpop.xlane.xlu1 %218 }
  0xeb   :  { %v2274_v21 = vpop.xlane.xlu0 %224 }
  0xed   :  { %v228_v24 = vpop.xlane.xlu1 %227 }
  0xef   :  { %v231_v23 = vpop.xlane.xlu0 %230 }
  0xf1   :  { %v2278_v26 = vpop.xlane.xlu1 %251 }
  0xf3   :  { %v2276_v25 = vpop.xlane.xlu0 %233 }
  0xf5   :  { %v2282_v31 = vpop.xlane.xlu1 %236 }
  0xf7   :  { %v2280_v28 = vpop.xlane.xlu0 %254 }
  0xfb   :  { %v2284_v32 = vpop.xlane.xlu0 %257 }
  0xff   :  { %v2294_v45 = vpop.xlane.xlu0 %260 }
 0x101   :  { %v2223_v35 = vpop.f32.mrf.mxu0 }
 0x103   :  { %v2225_v36 = vpop.f32.mrf.mxu0  ;;  %v2305_v55 = vpop.xlane.xlu0 %263 }
 0x104   :  { %1837 = vmatprep.mubr.msk.f32.mxu1 %vm378_vm2, %v2225_v36 }
 0x105   :  { %1838 = vmatmul.mubr.msk.f32.vlgmr.msra.gmra.mxu1 %vm378_vm2, %v2223_v35  ;;  %v2231_v37 = vpop.f32.mrf.mxu0 }
 0x107   :  { %v2233_v38 = vpop.f32.mrf.mxu0 }
 0x108   :  { %1840 = vmatprep.mubr.msk.f32.mxu1 %vm378_vm2, %v2233_v38 }
 0x109   :  { %1841 = vmatmul.mubr.msk.f32.gmra.mxu1 %vm378_vm2, %v2231_v37 }
 0x1c5   :  { %v2244_v41 = vpop.f32.mrf.mxu1 }
 0x1c6   :  { %v503_v43 = vmul.f32 %v2244_v41, %v1766_v40  ;;  %v482_v48 = vmul.f32 %v2244_v41, %v1765_v42 }
 0x1c7   :  { %v457_v44 = vpop.f32.mrf.mxu1 }
 0x1c8   :  { %1844 = vmatpush3.msra.mxu0 %v457_v44  ;;  %v509_v46 = vsel %vm378_vm2, %v503_v43, 0.0  ;;  %v502_v47 = vmul.f32 %v1766_v40, %v457_v44  ;;  %v481_v52 = vmul.f32 %v1765_v42, %v457_v44  ;;  %v488_v56 = vsel %vm378_vm2, %v482_v48, 0.0 }
 0x1c9   :  { %510 = vadd.xlane.f32.xlu1 %v509_v46  ;;  %v2252_v49 = vpop.f32.mrf.mxu1  ;;  %1848 = vmatprep.subr.mxu0 %v2076_v39  ;;  %v614_v43 = vrot.slane %v180_v6, %v2286_v33  ;;  %v618_v44 = vrot.slane %v183_v8, %v2286_v33  ;;  %v654_v46 = vrot.slane %v210_v16, %v2286_v33 }
 0x1ca   :  { %v506_v51 = vsel %vm378_vm2, %v502_v47, 0.0  ;;  %v485_v58 = vsel %vm378_vm2, %v481_v52, 0.0  ;;  %v505_v63 = vmul.f32 %v2252_v49, %v1766_v40  ;;  %v484_v4 = vmul.f32 %v2252_v49, %v1765_v42 }
 0x1cb   :  { %507 = vadd.xlane.f32.xlu0 %v506_v51  ;;  %v467_v54 = vpop.f32.mrf.mxu1  ;;  %v622_v48 = vrot.slane %v186_v7, %v2286_v33  ;;  %v739_v50 = vsel %vm540_vm3, %v618_v44, %v614_v43  ;;  %v658_v51 = vrot.slane %v213_v17, %v2286_v33  ;;  %v638_v7 = vrot.slane %v2270_v15, %v2286_v33 }
 0x1cc   :  { %1854 = vmatpush3.msra.mxu1 %v467_v54  ;;  %v504_v0 = vmul.f32 %v1766_v40, %v467_v54  ;;  %v515_v1 = vsel %vm378_vm2, %v505_v63, 0.0  ;;  %v483_v2 = vmul.f32 %v1765_v42, %v467_v54  ;;  %v494_v5 = vsel %vm378_vm2, %v484_v4, 0.0  ;;  %v2290_v42 = vpop.xlane.xlu1 %239 }
 0x1cd   :  { %489 = vadd.xlane.f32.xlu1 %v488_v56  ;;  %v646_v40 = vrot.slane %v204_v13, %v2286_v33  ;;  %v626_v54 = vrot.slane %v189_v9, %v2286_v33  ;;  %v740_v56 = vsel %vm541_vm4, %v622_v48, %v739_v50  ;;  %v674_v9 = vrot.slane %v2274_v21, %v2286_v33 }
 0x1ce   :  { %v512_v3 = vsel %vm378_vm2, %v504_v0, 0.0  ;;  %v491_v11 = vsel %vm378_vm2, %v483_v2, 0.0  ;;  %v634_v0 = vrot.slane %v195_v12, %v2286_v33  ;;  %v686_v12 = vrot.slane %v2276_v25, %v2286_v33 }
 0x1cf   :  { %486 = vadd.xlane.f32.xlu0 %v485_v58  ;;  %v746_v47 = vsel %vm540_vm3, %v650_v34, %v646_v40  ;;  %v741_v60 = vsel %vm543_vm5, %v626_v54, %v740_v56  ;;  %v642_v16 = vrot.slane %v2272_v18, %v2286_v33  ;;  %v710_v15 = vrot.slane %v2278_v26, %v2286_v33 }
 0x1d0   :  { %v2301_v52 = vpop.xlane.xlu1 %242  ;;  %v747_v53 = vsel %vm541_vm4, %v654_v46, %v746_v47  ;;  %v694_v40 = vrot.slane %v2290_v42, %v2286_v33  ;;  %v2361_v47 = vld [vmem:[#allocation5] sm:$0xff]  ;;  %v722_v48 = vrot.slane %v2294_v45, %v2286_v33  ;;  %v726_v45 = vrot.slane %v2305_v55, %v2286_v33 }
 0x1d1   :  { %269 = vadd.xlane.f32.xlu1 %v268_v59  ;;  %v748_v58 = vsel %vm543_vm5, %v658_v51, %v747_v53  ;;  %v630_v59 = vrot.slane %v192_v10, %v2286_v33  ;;  %v698_v53 = vrot.slane %v2301_v52, %v2286_v33  ;;  %vm787_vm13 = vcmp.gt.f32.partialorder %v2361_v47, 0.5 }
 0x1d2   :  { %v749_v63 = vsel %vm545_vm6, %v662_v57, %v748_v58 }
 0x1d3   :  { %248 = vadd.xlane.f32.xlu0 %v247_v61  ;;  %v666_v61 = vrot.slane %v219_v22, %v2286_v33  ;;  %v742_v2 = vsel %vm545_vm6, %v630_v59, %v741_v60 }
 0x1d4   :  { %v743_v8 = vsel %vm547_vm7, %v634_v0, %v742_v2 }
 0x1d5   :  { %272 = vadd.xlane.f32.xlu1 %v271_v62  ;;  %v2313_v62 = vpop.xlane.xlu1 %245  ;;  %v750_v4 = vsel %vm547_vm7, %v666_v61, %v749_v63  ;;  %v744_v21 = vsel %vm549_vm8, %v638_v7, %v743_v8 }
 0x1d6   :  { %v702_v52 = vrot.slane %v2313_v62, %v2286_v33 }
 0x1d7   :  { %516 = vadd.xlane.f32.xlu0 %v515_v1  ;;  %v2317_v1 = vpop.xlane.xlu0 %266 }
 0x1d9   :  { %513 = vadd.xlane.f32.xlu1 %v512_v3  ;;  %v670_v3 = vrot.slane %v222_v19, %v2286_v33  ;;  %v714_v19 = vrot.slane %v2280_v28, %v2286_v33  ;;  %v718_v28 = vrot.slane %v2284_v32, %v2286_v33 }
 0x1db   :  { %492 = vadd.xlane.f32.xlu0 %v491_v11  ;;  %v678_v11 = vrot.slane %v228_v24, %v2286_v33  ;;  %v751_v14 = vsel %vm549_vm8, %v670_v3, %v750_v4  ;;  %v690_v24 = vrot.slane %v2282_v31, %v2286_v33  ;;  %v760_v34 = vsel %vm540_vm3, %v714_v19, %v710_v15 }
 0x1dc   :  { %v2345_v18 = vsel %vm551_vm9, %v674_v9, %v751_v14  ;;  %v2357_v31 = vsel %vm551_vm9, %v642_v16, %v744_v21  ;;  %v761_v42 = vsel %vm541_vm4, %v718_v28, %v760_v34  ;;  %v730_v3 = vrot.slane %v2317_v1, %v2286_v33  ;;  %v2396_v16 = vld [vmem:[#allocation5 + $0x10] sm:$0xff]  ;;  %v2403_v21 = vld [vmem:[#allocation5 + $0x18] sm:$0xff] }
 0x1dd   :  { %495 = vadd.xlane.f32.xlu1 %v494_v5  ;;  %v682_v5 = vrot.slane %v231_v23, %v2286_v33  ;;  %v762_v60 = vsel %vm543_vm5, %v722_v48, %v761_v42  ;;  %vm789_vm15 = vcmp.gt.f32.partialorder %v2396_v16, 0.5 }
 0x1df   :  { %v753_v17 = vsel %vm540_vm3, %v682_v5, %v678_v11  ;;  %v763_v5 = vsel %vm545_vm6, %v726_v45, %v762_v60  ;;  %vm790_vm3 = vcmp.gt.f32.partialorder %v2403_v21, 0.5 }
 0x1e0   :  { %v754_v26 = vsel %vm541_vm4, %v686_v12, %v753_v17  ;;  %v764_v12 = vsel %vm547_vm7, %v730_v3, %v763_v5  ;;  %vm2077_vm4 = vmmov 0  }
 0x1e1   :  { %v755_v32 = vsel %vm543_vm5, %v690_v24, %v754_v26  ;;  %1845 = vmatprep.mubr.msk.f32.mxu0 %vm2077_vm4, %v2076_v39  ;;  %1855 = vmatprep.mubr.msk.f32.mxu1 %vm2077_vm4, %v2076_v39 }
 0x1e2   :  { %v756_v58 = vsel %vm545_vm6, %v694_v40, %v755_v32 }
 0x1e3   :  { %v757_v2 = vsel %vm547_vm7, %v698_v53, %v756_v58 }
 0x1e4   :  { %v758_v9 = vsel %vm549_vm8, %v702_v52, %v757_v2 }
 0x252   :  { %v511_v6 = vpop.xlane.xlu1 %510 }
 0x253   :  { %v531_v13 = vrot.slane %v511_v6, %v2286_v33 }
 0x254   :  { %v508_v10 = vpop.xlane.xlu0 %507 }
 0x255   :  { %v527_v22 = vrot.slane %v508_v10, %v2286_v33 }
 0x256   :  { %v490_v20 = vpop.xlane.xlu1 %489 }
 0x257   :  { %v576_v23 = vadd.f32 %v531_v13, %v490_v20 }
 0x258   :  { %v487_v25 = vpop.xlane.xlu0 %486 }
 0x259   :  { %v772_v29 = vadd.f32 %v2345_v18, %v576_v23  ;;  %v575_v30 = vadd.f32 %v527_v22, %v487_v25 }
 0x25a   :  { %v270_v43 = vpop.xlane.xlu1 %269 }
 0x25b   :  { %v771_v44 = vadd.f32 %v2357_v31, %v575_v30  ;;  %vm776_vm10 = vcmp.gt.f32.partialorder %v772_v29, 0.0  ;;  %v780_v46 = vmul.f32 0.2, %v772_v29  ;;  %v734_v6 = vrot.slane %v270_v43, %v2286_v33 }
 0x25c   :  { %v249_v50 = vpop.xlane.xlu0 %248 }
 0x25d   :  { %v784_v51 = vsel %vm776_vm10, %v772_v29, %v780_v46  ;;  %vm775_vm12 = vcmp.gt.f32.partialorder %v771_v44, 0.0  ;;  %v779_v57 = vmul.f32 0.2, %v771_v44  ;;  %v706_v55 = vrot.slane %v249_v50, %v2286_v33 }
 0x25e   :  { %v273_v54 = vpop.xlane.xlu1 %272  ;;  %v792_v56 = vsel %vm788_vm11, %v784_v51, -1e+09  ;;  %v765_v17 = vsel %vm549_vm8, %v734_v6, %v764_v12 }
 0x25f   :  { %v798_v59 = vsel %vm177_vm1, %v792_v56, -inf  ;;  %v783_v63 = vsel %vm775_vm12, %v771_v44, %v779_v57  ;;  %v738_v62 = vrot.slane %v273_v54, %v2286_v33  ;;  %v2394_v13 = vsel %vm551_vm9, %v706_v55, %v758_v9 }
 0x260   :  { %v517_v61 = vpop.xlane.xlu0 %516  ;;  %799 = vmax.xlane.f32.xlu1 %v798_v59  ;;  %v791_v0 = vsel %vm787_vm13, %v783_v63, -1e+09 }
 0x261   :  { %v795_v11 = vsel %vm177_vm1, %v791_v0, -inf  ;;  %v539_v10 = vrot.slane %v517_v61, %v2286_v33  ;;  %v2401_v20 = vsel %vm551_vm9, %v738_v62, %v765_v17  ;;  %vm1728_vm9 = vcmask 785408  }
 0x262   :  { %v514_v4 = vpop.xlane.xlu1 %513  ;;  %796 = vmax.xlane.f32.xlu0 %v795_v11 }
 0x263   :  { %v535_v7 = vrot.slane %v514_v4, %v2286_v33 }
 0x264   :  { %v493_v8 = vpop.xlane.xlu0 %492 }
 0x265   :  { %v577_v1 = vadd.f32 %v535_v7, %v493_v8 }
 0x266   :  { %v496_v14 = vpop.xlane.xlu1 %495 }
 0x267   :  { %v773_v15 = vadd.f32 %v2394_v13, %v577_v1  ;;  %v578_v19 = vadd.f32 %v539_v10, %v496_v14  ;;  %v1138_v10 = vld [vmem:[#allocation10 + $0x30] sm:$0xff]  ;;  %v1136_v1 = vld [vmem:[#allocation10 + $0x20] sm:$0xff] }
 0x269   :  { %v774_v22 = vadd.f32 %v2401_v20, %v578_v19  ;;  %vm777_vm14 = vcmp.gt.f32.partialorder %v773_v15, 0.0  ;;  %v781_v23 = vmul.f32 0.2, %v773_v15 }
 0x26b   :  { %v785_v24 = vsel %vm777_vm14, %v773_v15, %v781_v23  ;;  %vm778_vm0 = vcmp.gt.f32.partialorder %v774_v22, 0.0  ;;  %v782_v25 = vmul.f32 0.2, %v774_v22 }
 0x26c   :  { %v793_v26 = vsel %vm789_vm15, %v785_v24, -1e+09 }
 0x26d   :  { %v801_v28 = vsel %vm177_vm1, %v793_v26, -inf  ;;  %v786_v29 = vsel %vm778_vm0, %v774_v22, %v782_v25 }
 0x26e   :  { %802 = vmax.xlane.f32.xlu0 %v801_v28  ;;  %v794_v30 = vsel %vm790_vm3, %v786_v29, -1e+09 }
 0x26f   :  { %v804_v34 = vsel %vm177_vm1, %v794_v30, -inf }
 0x270   :  { %805 = vmax.xlane.f32.xlu1 %v804_v34 }
 0x2e9   :  { %v800_v40 = vpop.xlane.xlu1 %799 }
 0x2ea   :  { %v808_v43 = vsub.f32 %v792_v56, %v800_v40 }
 0x2eb   :  { %v797_v46 = vpop.xlane.xlu0 %796 }
 0x2ec   :  { %v813_v44 = vmul.f32 1.442695, %v808_v43  ;;  %v807_v32 = vsub.f32 %v791_v0, %v797_v46  ;;  %v1139_v0 = vld [vmem:[#allocation10 + $0x38] sm:$0xff] }
 0x2ed   :  { %1863 = vmatprep.subr.mxu1 %v1139_v0 }
 0x2ee   :  { %1909 = vpow2.f32 %v813_v44  ;;  %v811_v48 = vmul.f32 1.442695, %v807_v32  ;;  %v1776_v44 = vld [vmem:[%s2557_s6 + $0x1] ss:$0 sm:$0xff]  ;;  %s2079_s6 = smov 64  }
 0x2f0   :  { %1911 = vpow2.f32 %v811_v48 }
 0x2f7   :  { %v803_v50 = vpop.xlane.xlu0 %802 }
 0x2f8   :  { %v809_v42 = vsub.f32 %v793_v26, %v803_v50 }
 0x2f9   :  { %v806_v51 = vpop.xlane.xlu1 %805 }
 0x2fa   :  { %v815_v53 = vmul.f32 1.442695, %v809_v42  ;;  %v810_v54 = vsub.f32 %v794_v30, %v806_v51  ;;  %v1775_v30 = vld [vmem:[%s2556_s5 + $0x1] ss:$0 sm:$0xff]  ;;  %s2078_s5 = smov 32  }
 0x2fb   :  { %v1910_v57 = vpop.eup %1909 }
 0x2fc   :  { %1913 = vpow2.f32 %v815_v53  ;;  %v817_v58 = vmul.f32 1.442695, %v810_v54  ;;  %v822_v45 = vsel %vm177_vm1, %v1910_v57, 0.0 }
 0x2fd   :  { %823 = vadd.xlane.f32.xlu1 %v822_v45  ;;  %v1912_v59 = vpop.eup %1911 }
 0x2fe   :  { %1915 = vpow2.f32 %v817_v58  ;;  %v819_v56 = vsel %vm177_vm1, %v1912_v59, 0.0 }
 0x2ff   :  { %820 = vadd.xlane.f32.xlu0 %v819_v56 }
 0x309   :  { %v1914_v60 = vpop.eup %1913 }
 0x30a   :  { %v825_v61 = vsel %vm177_vm1, %v1914_v60, 0.0 }
 0x30b   :  { %v1916_v63 = vpop.eup %1915  ;;  %826 = vadd.xlane.f32.xlu0 %v825_v61 }
 0x30c   :  { %v828_v52 = vsel %vm177_vm1, %v1916_v63, 0.0 }
 0x30d   :  { %829 = vadd.xlane.f32.xlu1 %v828_v52 }
 0x386   :  { %v824_v2 = vpop.xlane.xlu1 %823 }
 0x388   :  { %v821_v3 = vpop.xlane.xlu0 %820 }
 0x389   :  { %1917 = vrcp.f32 %v821_v3 }
 0x38a   :  { %1919 = vrcp.f32 %v824_v2 }
 0x394   :  { %v827_v55 = vpop.xlane.xlu0 %826 }
 0x395   :  { %1921 = vrcp.f32 %v827_v55 }
 0x396   :  { %v830_v4 = vpop.xlane.xlu1 %829  ;;  %v1918_v11 = vpop.eup %1917 }
 0x397   :  { %1923 = vrcp.f32 %v830_v4  ;;  %v832_v5 = vmul.f32 %v1918_v11, %v1912_v59  ;;  %v1920_v6 = vpop.eup %1919 }
 0x398   :  { %v834_v7 = vmul.f32 %v1920_v6, %v1910_v57 }
 0x399   :  { %1846 = vmatmul.mubr.msk.f32.vlgmr.msra.gmra.mxu0 %vm177_vm1, %v832_v5 }
 0x39a   :  { %1849 = vmatpush3.msra.mxu0 %v2244_v41  ;;  %1850 = vmatprep.mubr.msk.f32.mxu0 %vm2077_vm4, %v2076_v39 }
 0x39b   :  { %1858 = vmatprep.subr.mxu0 %v2076_v39 }
 0x39d   :  { %1851 = vmatmul.mubr.msk.f32.vlgmr.msra.gmra.mxu0 %vm177_vm1, %v834_v7 }
 0x39e   :  { %1859 = vmatpush3.msra.mxu0 %v2252_v49  ;;  %1860 = vmatprep.mubr.msk.f32.mxu0 %vm2077_vm4, %v2076_v39  ;;  %v1137_v49 = vld [vmem:[#allocation10 + $0x28] sm:$0xff] }
 0x39f   :  { %1877 = vmatprep.subr.mxu0 %v2076_v39 }
 0x3a2   :  { %v1922_v62 = vpop.eup %1921 }
 0x3a3   :  { %v836_v8 = vmul.f32 %v1922_v62, %v1914_v60 }
 0x3a4   :  { %v1924_v9 = vpop.eup %1923 }
 0x3a5   :  { %1856 = vmatmul.mubr.msk.f32.vlgmr.msra.gmra.mxu1 %vm177_vm1, %v836_v8  ;;  %v838_v41 = vmul.f32 %v1924_v9, %v1916_v63 }
 0x3a6   :  { %1864 = vmatpush3.msra.mxu1 %v1139_v0 }
 0x3a7   :  { %1861 = vmatmul.mubr.msk.f32.vlgmr.msra.gmra.mxu0 %vm177_vm1, %v838_v41  ;;  %1865 = vmatprep.subr.mxu1 %v1138_v10 }
 0x3a8   :  { %1879 = vmatprep.mubr.msk.f32.mxu0 %vm2077_vm4, %v2076_v39  ;;  %1866 = vmatpush3.msra.mxu1 %v1138_v10 }
 0x3a9   :  { %1867 = vmatprep.subr.mxu1 %v1137_v49 }
 0x3aa   :  { %1868 = vmatpush3.msra.mxu1 %v1137_v49 }
 0x3ab   :  { %1869 = vmatprep.subr.mxu1 %v1136_v1 }
 0x3ac   :  { %1870 = vmatpush3.msra.mxu1 %v1136_v1 }
 0x3ad   :  { %1892 = vmatprep.subr.mxu1 %v2076_v39 }
 0x459   :  { %v2437_v12 = vpop.f32.mrf.mxu0 }
 0x45a   :  { %v1131_v14 = vmax.f32 %v2437_v12, 0.0 }
 0x45b   :  { %v1847_v17 = vpop.f32.mrf.mxu0 }
 0x45c   :  { %1871 = vmatprep.mubr.msk.f32.mxu1 %vm378_vm2, %v1131_v14 }
 0x45d   :  { %v2443_v15 = vpop.f32.mrf.mxu0 }
 0x45e   :  { %v1132_v19 = vmax.f32 %v2443_v15, 0.0 }
 0x45f   :  { %v1852_v22 = vpop.f32.mrf.mxu0 }
 0x460   :  { %1872 = vmatmul.mubr.msk.f32.vlgmr.msra.gmra.mxu1 %vm378_vm2, %v1132_v19 }
 0x465   :  { %v2449_v23 = vpop.f32.mrf.mxu1 }
 0x466   :  { %v1133_v24 = vmax.f32 %v2449_v23, 0.0 }
 0x467   :  { %v1857_v25 = vpop.f32.mrf.mxu1  ;;  %v2452_v26 = vpop.f32.mrf.mxu0 }
 0x468   :  { %v1134_v28 = vmax.f32 %v2452_v26, 0.0  ;;  %1874 = vmatprep.mubr.msk.f32.mxu1 %vm378_vm2, %v1133_v24 }
 0x469   :  { %v1862_v29 = vpop.f32.mrf.mxu0 }
 0x46a   :  { %1875 = vmatmul.mubr.msk.f32.gmra.mxu1 %vm378_vm2, %v1134_v28 }
 0x46b   :  { %1894 = vmatprep.mubr.msk.f32.mxu1 %vm2077_vm4, %v2076_v39 }
 0x520   :  { %v2466_v34 = vpop.f32.mrf.mxu1 }
 0x521   :  { %v1243_v40 = vmul.f32 %v2466_v34, %v1775_v30  ;;  %v1264_v42 = vmul.f32 %v2466_v34, %v1776_v44 }
 0x522   :  { %v1218_v43 = vpop.f32.mrf.mxu1 }
 0x523   :  { %1878 = vmatpush3.msra.mxu0 %v1218_v43  ;;  %v1249_v46 = vsel %vm378_vm2, %v1243_v40, 0.0  ;;  %v1263_v32 = vmul.f32 %v1776_v44, %v1218_v43  ;;  %v1242_v48 = vmul.f32 %v1775_v30, %v1218_v43  ;;  %v1270_v53 = vsel %vm378_vm2, %v1264_v42, 0.0 }
 0x524   :  { %1250 = vadd.xlane.f32.xlu1 %v1249_v46  ;;  %1882 = vmatprep.subr.mxu0 %v2076_v39 }
 0x525   :  { %v1267_v50 = vsel %vm378_vm2, %v1263_v32, 0.0  ;;  %v1246_v51 = vsel %vm378_vm2, %v1242_v48, 0.0 }
 0x526   :  { %1268 = vadd.xlane.f32.xlu0 %v1267_v50 }
 0x528   :  { %1247 = vadd.xlane.f32.xlu1 %v1246_v51 }
 0x52a   :  { %v1876_v54 = vpop.f32.mrf.mxu1  ;;  %1271 = vadd.xlane.f32.xlu0 %v1270_v53 }
 0x52b   :  { %1893 = vmatpush3.msra.mxu1 %v1876_v54  ;;  %v1266_v57 = vmul.f32 %v1876_v54, %v1776_v44  ;;  %v1245_v56 = vmul.f32 %v1876_v54, %v1775_v30 }
 0x52c   :  { %v2478_v58 = vpop.f32.mrf.mxu1 }
 0x52d   :  { %v1276_v45 = vsel %vm378_vm2, %v1266_v57, 0.0  ;;  %v1265_v59 = vmul.f32 %v1776_v44, %v2478_v58  ;;  %v1244_v61 = vmul.f32 %v1775_v30, %v2478_v58  ;;  %v1255_v63 = vsel %vm378_vm2, %v1245_v56, 0.0 }
 0x52e   :  { %1277 = vadd.xlane.f32.xlu1 %v1276_v45 }
 0x52f   :  { %v1273_v60 = vsel %vm378_vm2, %v1265_v59, 0.0  ;;  %v1252_v52 = vsel %vm378_vm2, %v1244_v61, 0.0 }
 0x530   :  { %1274 = vadd.xlane.f32.xlu0 %v1273_v60 }
 0x532   :  { %1256 = vadd.xlane.f32.xlu1 %v1255_v63 }
 0x534   :  { %1253 = vadd.xlane.f32.xlu0 %v1252_v52 }
 0x5ad   :  { %v1251_v0 = vpop.xlane.xlu1 %1250 }
 0x5af   :  { %v1269_v2 = vpop.xlane.xlu0 %1268 }
 0x5b0   :  { %v1286_v3 = vrot.slane %v1269_v2, %v2286_v33 }
 0x5b1   :  { %v1248_v55 = vpop.xlane.xlu1 %1247 }
 0x5b2   :  { %v1327_v4 = vadd.f32 %v1286_v3, %v1248_v55 }
 0x5b3   :  { %v1272_v11 = vpop.xlane.xlu0 %1271 }
 0x5b4   :  { %v1331_v5 = vadd.f32 %v1327_v4, %v2357_v31  ;;  %v1290_v6 = vrot.slane %v1272_v11, %v2286_v33 }
 0x5b6   :  { %v1328_v7 = vadd.f32 %v1290_v6, %v1251_v0  ;;  %vm1335_vm5 = vcmp.gt.f32.partialorder %v1331_v5, 0.0  ;;  %v1339_v8 = vmul.f32 0.2, %v1331_v5 }
 0x5b7   :  { %v1278_v62 = vpop.xlane.xlu1 %1277 }
 0x5b8   :  { %v1332_v9 = vadd.f32 %v1328_v7, %v2345_v18  ;;  %v1343_v10 = vsel %vm1335_vm5, %v1331_v5, %v1339_v8  ;;  %v1298_v49 = vrot.slane %v1278_v62, %v2286_v33 }
 0x5b9   :  { %v1275_v41 = vpop.xlane.xlu0 %1274  ;;  %v1347_v1 = vsel %vm787_vm13, %v1343_v10, -1e+09 }
 0x5ba   :  { %v1351_v22 = vsel %vm177_vm1, %v1347_v1, -inf  ;;  %vm1336_vm6 = vcmp.gt.f32.partialorder %v1332_v9, 0.0  ;;  %v1340_v31 = vmul.f32 0.2, %v1332_v9  ;;  %v1294_v25 = vrot.slane %v1275_v41, %v2286_v33 }
 0x5bb   :  { %v1257_v17 = vpop.xlane.xlu1 %1256  ;;  %1352 = vmax.xlane.f32.xlu0 %v1351_v22 }
 0x5bc   :  { %v1330_v29 = vadd.f32 %v1298_v49, %v1257_v17  ;;  %v1344_v40 = vsel %vm1336_vm6, %v1332_v9, %v1340_v31 }
 0x5bd   :  { %v1254_v30 = vpop.xlane.xlu0 %1253  ;;  %v1348_v44 = vsel %vm788_vm11, %v1344_v40, -1e+09 }
 0x5be   :  { %v1334_v18 = vadd.f32 %v1330_v29, %v2401_v20  ;;  %v1329_v43 = vadd.f32 %v1294_v25, %v1254_v30  ;;  %v1354_v47 = vsel %vm177_vm1, %v1348_v44, -inf }
 0x5bf   :  { %1355 = vmax.xlane.f32.xlu1 %v1354_v47 }
 0x5c0   :  { %v1333_v46 = vadd.f32 %v1329_v43, %v2394_v13  ;;  %vm1338_vm7 = vcmp.gt.f32.partialorder %v1334_v18, 0.0  ;;  %v1342_v32 = vmul.f32 0.2, %v1334_v18 }
 0x5c2   :  { %v1346_v48 = vsel %vm1338_vm7, %v1334_v18, %v1342_v32  ;;  %vm1337_vm8 = vcmp.gt.f32.partialorder %v1333_v46, 0.0  ;;  %v1341_v33 = vmul.f32 0.2, %v1333_v46 }
 0x5c3   :  { %v1350_v50 = vsel %vm790_vm3, %v1346_v48, -1e+09 }
 0x5c4   :  { %v1360_v42 = vsel %vm177_vm1, %v1350_v50, -inf  ;;  %v1345_v20 = vsel %vm1337_vm8, %v1333_v46, %v1341_v33 }
 0x5c5   :  { %1361 = vmax.xlane.f32.xlu1 %v1360_v42  ;;  %v1349_v27 = vsel %vm789_vm15, %v1345_v20, -1e+09 }
 0x5c6   :  { %v1357_v51 = vsel %vm177_vm1, %v1349_v27, -inf }
 0x5c7   :  { %1358 = vmax.xlane.f32.xlu0 %v1357_v51 }
 0x644   :  { %v1353_v13 = vpop.xlane.xlu0 %1352 }
 0x645   :  { %v1363_v53 = vsub.f32 %v1347_v1, %v1353_v13 }
 0x647   :  { %v1367_v54 = vmul.f32 1.442695, %v1363_v53 }
 0x648   :  { %v1356_v57 = vpop.xlane.xlu1 %1355 }
 0x649   :  { %1925 = vpow2.f32 %v1367_v54  ;;  %v1364_v45 = vsub.f32 %v1348_v44, %v1356_v57 }
 0x64b   :  { %v1369_v59 = vmul.f32 1.442695, %v1364_v45 }
 0x64d   :  { %1927 = vpow2.f32 %v1369_v59 }
 0x64e   :  { %v1362_v21 = vpop.xlane.xlu1 %1361 }
 0x64f   :  { %v1366_v56 = vsub.f32 %v1350_v50, %v1362_v21 }
 0x650   :  { %v1359_v60 = vpop.xlane.xlu0 %1358 }
 0x651   :  { %v1373_v61 = vmul.f32 1.442695, %v1366_v56  ;;  %v1365_v63 = vsub.f32 %v1349_v27, %v1359_v60 }
 0x653   :  { %1929 = vpow2.f32 %v1373_v61  ;;  %v1371_v52 = vmul.f32 1.442695, %v1365_v63 }
 0x655   :  { %1931 = vpow2.f32 %v1371_v52 }
 0x656   :  { %v1926_v16 = vpop.eup %1925 }
 0x657   :  { %v1375_v0 = vsel %vm177_vm1, %v1926_v16, 0.0 }
 0x658   :  { %1376 = vadd.xlane.f32.xlu0 %v1375_v0 }
 0x65a   :  { %v1928_v2 = vpop.eup %1927 }
 0x65b   :  { %v1378_v3 = vsel %vm177_vm1, %v1928_v2, 0.0 }
 0x65c   :  { %1379 = vadd.xlane.f32.xlu1 %v1378_v3 }
 0x660   :  { %v1930_v55 = vpop.eup %1929 }
 0x661   :  { %v1384_v4 = vsel %vm177_vm1, %v1930_v55, 0.0 }
 0x662   :  { %v1932_v11 = vpop.eup %1931  ;;  %1385 = vadd.xlane.f32.xlu1 %v1384_v4 }
 0x663   :  { %v1381_v5 = vsel %vm177_vm1, %v1932_v11, 0.0 }
 0x664   :  { %1382 = vadd.xlane.f32.xlu0 %v1381_v5 }
 0x673   :  { %1693 = vrot.lane.b32.xlu1 %v1132_v19, %s2078_s5 }
 0x677   :  { %1695 = vrot.lane.b32.xlu1 %v1133_v24, %s2078_s5 }
 0x67a   :  { %1691 = vrot.lane.b32.xlu0 %v1131_v14, %s2078_s5 }
 0x67b   :  { %1697 = vrot.lane.b32.xlu1 %v1134_v28, %s2078_s5 }
 0x6e1   :  { %v1377_v6 = vpop.xlane.xlu0 %1376 }
 0x6e2   :  { %1933 = vrcp.f32 %v1377_v6 }
 0x6e5   :  { %v1380_v7 = vpop.xlane.xlu1 %1379 }
 0x6e6   :  { %1935 = vrcp.f32 %v1380_v7 }
 0x6eb   :  { %v1386_v62 = vpop.xlane.xlu1 %1385 }
 0x6ec   :  { %1937 = vrcp.f32 %v1386_v62 }
 0x6ed   :  { %v1383_v8 = vpop.xlane.xlu0 %1382 }
 0x6ee   :  { %1939 = vrcp.f32 %v1383_v8 }
 0x6ef   :  { %v1934_v9 = vpop.eup %1933  ;;  %v1694_v29 = vpop.permute.xlu1 %1693 }
 0x6f0   :  { %v1388_v15 = vmul.f32 %v1934_v9, %v1926_v16  ;;  %v1720_v32 = vsel %vm378_vm2, %v2223_v35, %v1694_v29 }
 0x6f1   :  { %v1692_v40 = vpop.permute.xlu0 %1691 }
 0x6f2   :  { %1880 = vmatmul.mubr.msk.f32.vlgmr.msra.gmra.mxu0 %vm177_vm1, %v1388_v15  ;;  %v1719_v18 = vsel %vm378_vm2, %v2225_v36, %v1692_v40 }
 0x6f3   :  { %v1936_v19 = vpop.eup %1935  ;;  %1883 = vmatpush3.msra.mxu0 %v2466_v34  ;;  %1884 = vmatprep.mubr.msk.f32.mxu0 %vm2077_vm4, %v2076_v39  ;;  %v1696_v30 = vpop.permute.xlu1 %1695 }
 0x6f4   :  { %1887 = vmatprep.subr.mxu0 %v2076_v39  ;;  %v1390_v12 = vmul.f32 %v1936_v19, %v1928_v2  ;;  %v1721_v27 = vsel %vm378_vm2, %v2233_v38, %v1696_v30 }
 0x6f6   :  { %1885 = vmatmul.mubr.msk.f32.vlgmr.msra.gmra.mxu0 %vm177_vm1, %v1390_v12 }
 0x6f7   :  { %1888 = vmatpush3.msra.mxu0 %v2478_v58  ;;  %1889 = vmatprep.mubr.msk.f32.mxu0 %vm2077_vm4, %v2076_v39  ;;  %v1698_v43 = vpop.permute.xlu1 %1697 }
 0x6f8   :  { %v1722_v42 = vsel %vm378_vm2, %v2231_v37, %v1698_v43 }
 0x6f9   :  { %v1938_v14 = vpop.eup %1937 }
 0x6fa   :  { %v1394_v23 = vmul.f32 %v1938_v14, %v1930_v55 }
 0x6fb   :  { %v1940_v24 = vpop.eup %1939 }
 0x6fc   :  { %1895 = vmatmul.mubr.msk.f32.vlgmr.msra.gmra.mxu1 %vm177_vm1, %v1394_v23  ;;  %v1392_v26 = vmul.f32 %v1940_v24, %v1932_v11 }
 0x6fe   :  { %1890 = vmatmul.mubr.msk.f32.vlgmr.msra.gmra.mxu0 %vm177_vm1, %v1392_v26  ;;  %vm1723_vm1 = vcmask 523264  }
 0x7b2   :  { %v1464_v28 = vpop.f32.mrf.mxu0 }
 0x7b3   :  { %v1687_v34 = vmax.f32 %v1464_v28, 0.0 }
 0x7b4   :  { %v1881_v41 = vpop.f32.mrf.mxu0 }
 0x7b5   :  { %1707 = vrot.lane.b32.xlu0 %v1687_v34, %s2079_s6 }
 0x7b6   :  { %v1537_v10 = vpop.f32.mrf.mxu0 }
 0x7b7   :  { %v1688_v49 = vmax.f32 %v1537_v10, 0.0 }
 0x7b8   :  { %v1886_v1 = vpop.f32.mrf.mxu0 }
 0x7b9   :  { %1709 = vrot.lane.b32.xlu1 %v1688_v49, %s2079_s6 }
 0x7bc   :  { %v1683_v58 = vpop.f32.mrf.mxu1 }
 0x7bd   :  { %v1690_v17 = vmax.f32 %v1683_v58, 0.0 }
 0x7be   :  { %v1610_v39 = vpop.f32.mrf.mxu0  ;;  %v1896_v22 = vpop.f32.mrf.mxu1 }
 0x7bf   :  { %v1689_v31 = vmax.f32 %v1610_v39, 0.0  ;;  %1713 = vrot.lane.b32.xlu1 %v1690_v17, %s2079_s6 }
 0x7c0   :  { %v1891_v25 = vpop.f32.mrf.mxu0 }
 0x7c1   :  { %1711 = vrot.lane.b32.xlu0 %v1689_v31, %s2079_s6 }
 0x827   :  { %v1708_v44 = vpop.permute.xlu0 %1707 }
 0x828   :  { %v1724_v47 = vsel %vm1723_vm1, %v1719_v18, %v1708_v44 }
 0x829   :  { %v1729_v46 = vsel %vm1728_vm9, %v1724_v47, 0.0 }
 0x82a   :  { %1733 = vst [vmem:[#allocation11] sm:$0xff] %v1729_v46 }
 0x82b   :  { %v1710_v48 = vpop.permute.xlu1 %1709 }
 0x82c   :  { %v1725_v33 = vsel %vm1723_vm1, %v1720_v32, %v1710_v48 }
 0x82d   :  { %v1730_v50 = vsel %vm1728_vm9, %v1725_v33, 0.0 }
 0x82e   :  { %1734 = vst [vmem:[#allocation11 + $0x8] sm:$0xff] %v1730_v50 }
 0x831   :  { %v1714_v36 = vpop.permute.xlu1 %1713 }
 0x832   :  { %v1727_v20 = vsel %vm1723_vm1, %v1722_v42, %v1714_v36 }
 0x833   :  { %v1732_v51 = vsel %vm1728_vm9, %v1727_v20, 0.0  ;;  %v1712_v35 = vpop.permute.xlu0 %1711 }
 0x834   :  { %1736 = vst [vmem:[#allocation11 + $0x18] sm:$0xff] %v1732_v51  ;;  %v1726_v13 = vsel %vm1723_vm1, %v1721_v27, %v1712_v35 }
 0x835   :  { %v1731_v53 = vsel %vm1728_vm9, %v1726_v13, 0.0 }
 0x836   :  { %1735 = vst [vmem:[#allocation11 + $0x10] sm:$0xff] %v1731_v53 }
 0x837   :  { %2052 = shalt.err (!%p2049_p1)
}
 0x838   :  { %1748 = dma.vmem_to_hbm [thread:$0]  %s1743_s17, 512, %s2559_s8, [#allocation4], %s2071_s10, %s2071_s10, %s2072_s11  }
 0x839   :  { %2067 = dma.done.wait [#allocation4], 512  }
 0x83a   :  { %2068 = vsyncadd [#allocation4], 4294966784 }
 0x83b   :  { %1752 = vsyncpa [#allocation3], 1 }
 0x83c   :  { %1753 = vsyncpa [#allocation6], 1 }
 0x83d   :  { %1754 = vsyncpa [#allocation9], 1 }
 0x83e   :  { %1755 = vsyncpa [#allocation4], 1 }

</bundles_post_ra>
